<compile_context>
chip_gen: v6e
topology: v6e:2x2x1
jax: 0.10.0
libtpu: 0.0.40
codegen_flags: <defaults>
</compile_context>

<pallas_src>
import functools

import numpy as np
import jax
import jax.numpy as jnp
from jax.experimental import pallas as pl
from jax.experimental.pallas import tpu as pltpu

EPS = 1e-5


def _tap_offsets(dils):
    """Tap ordering shared by the kernel, the masks and the packed weight."""
    return [(0, 0)] + [(ky * d, kx * d) for d in dils
                       for ky in (-1, 0, 1) for kx in (-1, 0, 1)]


# ---------------------------------------------------------------------------
# Kernels
# ---------------------------------------------------------------------------

def conv_branches_kernel(x_ref, mask_ref, wbig_ref, bbig_ref,
                         y_ref, stats_ref, xmean_ref,
                         *, H, W, dils, pack_k, cin):
    """Branches 1-4 conv(+bias) for one image via rolled taps + one packed
    bf16 matmul; also emits partial BN stats and the spatial mean of x."""
    HW = H * W
    xf = x_ref[0]                                     # (Cin, HW) f32, lanes=HW
    offs = _tap_offsets(dils)

    def tap(t, dy, dx):
        if dy == 0 and dx == 0:                       # center tap: no shift
            return xf
        if abs(dx) >= W or abs(dy) >= H:              # statically all-masked
            return jnp.zeros_like(xf)
        s = dy * W + dx                               # flattened pixel shift
        # rolled[:, p] == xf[:, p + s]; boundary pixels zeroed by the mask.
        return jnp.roll(xf, -s, axis=1) * mask_ref[t:t + 1, :]

    if pack_k:
        # All 28 tap slices packed along K -> one matmul for all 4 branches.
        at = jnp.concatenate([tap(t, dy, dx) for t, (dy, dx) in enumerate(offs)],
                             axis=0)
        y = jnp.dot(wbig_ref[...], at.astype(jnp.bfloat16),
                    preferred_element_type=jnp.float32)
    else:
        # Large-Cin fallback: accumulate per-tap dots, one slice live at a time.
        y = jnp.zeros((wbig_ref.shape[0], HW), jnp.float32)
        for t, (dy, dx) in enumerate(offs):
            y = y + jnp.dot(wbig_ref[:, t * cin:(t + 1) * cin],
                            tap(t, dy, dx).astype(jnp.bfloat16),
                            preferred_element_type=jnp.float32)
    y = y + bbig_ref[...]                             # packed conv biases

    y_ref[...] = y.astype(y_ref.dtype)[None]          # bf16 inter-stage store
    stats_ref[...] = jnp.concatenate(                  # f32 partial BN stats
        [jnp.sum(y, axis=1, keepdims=True),
         jnp.sum(y * y, axis=1, keepdims=True)], axis=1)[None]
    xmean_ref[...] = (jnp.sum(xf, axis=1, keepdims=True) * (1.0 / HW))[None]


def branch_stats_kernel(stats_ref, xmean_ref, g14_ref, be14_ref,
                        w5_ref, b5_ref, g5_ref, be5_ref, wcat5_ref,
                        scale_ref, shift_ref, c5_ref, *, M):
    """Reduce partial BN stats -> per-branch scale/shift; run the global-pool
    branch and fold it through its slice of the conv_cat weight (f32: tiny)."""
    s = jnp.sum(stats_ref[...], axis=0)               # (4*Cout, 2)
    mean = s[:, 0:1] * (1.0 / M)
    var = s[:, 1:2] * (1.0 / M) - mean * mean
    scale = g14_ref[...] * jax.lax.rsqrt(var + EPS)
    scale_ref[...] = scale
    shift_ref[...] = be14_ref[...] - mean * scale

    n = xmean_ref.shape[0]
    xm = jnp.concatenate([xmean_ref[i] for i in range(n)], axis=1)  # (Cin, N)
    y5 = jnp.dot(w5_ref[...], xm,
                 preferred_element_type=jnp.float32) + b5_ref[...]  # (Cout, N)
    m5 = jnp.sum(y5, axis=1, keepdims=True) * (1.0 / n)
    v5 = jnp.sum(y5 * y5, axis=1, keepdims=True) * (1.0 / n) - m5 * m5
    r5 = jnp.maximum((y5 - m5) * jax.lax.rsqrt(v5 + EPS) * g5_ref[...]
                     + be5_ref[...], 0.0)
    c5 = jnp.dot(wcat5_ref[...], r5, preferred_element_type=jnp.float32)
    for i in range(n):
        c5_ref[i] = c5[:, i:i + 1]                    # (Cout, 1) per image


def cat_conv_kernel(y_ref, scale_ref, shift_ref, wcat_ref, bcat_ref, c5_ref,
                    z_ref, zstats_ref):
    """Per-branch BN+ReLU fused with concat + 1x1 conv_cat (branches are
    already contiguous along channels, so there is no concat temporary)."""
    a = jnp.maximum(y_ref[0].astype(jnp.float32) * scale_ref[...]
                    + shift_ref[...], 0.0)            # (4*Cout, TQ)
    z = (jnp.dot(wcat_ref[...], a.astype(jnp.bfloat16),
                 preferred_element_type=jnp.float32)
         + c5_ref[0] + bcat_ref[...])                 # (Cout, TQ)
    z_ref[...] = z.astype(z_ref.dtype)[None]
    zstats_ref[...] = jnp.concatenate(
        [jnp.sum(z, axis=1, keepdims=True),
         jnp.sum(z * z, axis=1, keepdims=True)], axis=1)[None, None]


def cat_bn_relu_kernel(z_ref, cs_ref, csh_ref, out_ref):
    """Pure elementwise final BN + ReLU (scale/shift precomputed outside)."""
    z = z_ref[0].astype(jnp.float32)
    out_ref[...] = jnp.maximum(z * cs_ref[...] + csh_ref[...],
                               0.0).astype(out_ref.dtype)[None]


# ---------------------------------------------------------------------------
# Wrapper (parameter folding + pallas_call plumbing only)
# ---------------------------------------------------------------------------

def aspp_pallas(x_nchw, p, rate=1):
    N, Cin, H, W = x_nchw.shape
    Cout = p["W1"].shape[0]
    HW = H * W
    M = N * HW
    dils = (6 * rate, 12 * rate, 18 * rate)
    offs = _tap_offsets(dils)
    n_taps = len(offs)                                 # 28
    Kbig = n_taps * Cin
    pack_k = Kbig <= 512                               # shape-conditional on Cin

    f32, bf16 = jnp.float32, jnp.bfloat16

    # Pixel tile for the pixelwise stages (multiple of 128 dividing HW).
    TQ = HW
    for cand in (2048, 1024, 512, 256, 128):
        if HW % cand == 0:
            TQ = cand
            break
    nT = HW // TQ

    # ------------------------- parameter folding -------------------------
    def col(v):                                        # (C,) -> (C, 1) f32
        return v.astype(f32).reshape(-1, 1)

    def tapcols(w):          # (Cout, Cin, 3, 3) -> (Cout, 9*Cin), tap-major
        return jnp.transpose(w.astype(f32), (0, 2, 3, 1)).reshape(Cout, 9 * Cin)

    wbig = jnp.zeros((4 * Cout, Kbig), f32)
    wbig = wbig.at[0:Cout, 0:Cin].set(p["W1"][:, :, 0, 0].astype(f32))
    wbig = wbig.at[Cout:2 * Cout, Cin:10 * Cin].set(tapcols(p["W2"]))
    wbig = wbig.at[2 * Cout:3 * Cout, 10 * Cin:19 * Cin].set(tapcols(p["W3"]))
    wbig = wbig.at[3 * Cout:4 * Cout, 19 * Cin:28 * Cin].set(tapcols(p["W4"]))
    wbig = wbig.astype(bf16)                           # bf16 MXU operand

    bbig = jnp.concatenate([col(p["b1"]), col(p["b2"]),
                            col(p["b3"]), col(p["b4"])], axis=0)
    g14 = jnp.concatenate([col(p["g1"]), col(p["g2"]),
                           col(p["g3"]), col(p["g4"])], axis=0)
    be14 = jnp.concatenate([col(p["be1"]), col(p["be2"]),
                            col(p["be3"]), col(p["be4"])], axis=0)

    w5 = p["W5"][:, :, 0, 0].astype(f32)               # (Cout, Cin)
    wcat2d = p["Wcat"][:, :, 0, 0].astype(f32)         # (Cout, 5*Cout)
    wcat14 = wcat2d[:, :4 * Cout].astype(bf16)         # (Cout, 4*Cout) bf16
    wcat5 = wcat2d[:, 4 * Cout:]                       # (Cout, Cout) f32

    # Constant 0/1 boundary masks for every tap (built once, tiny input).
    yy, xx = np.mgrid[0:H, 0:W]
    masks = jnp.asarray(np.stack(
        [((xx + dx >= 0) & (xx + dx < W) & (yy + dy >= 0) & (yy + dy < H))
         .reshape(HW) for dy, dx in offs]).astype(np.float32))       # (28, HW)

    # NCHW input used directly: free reshape, no transpose / pad / halo.
    x3 = x_nchw.reshape(N, Cin, HW).astype(f32)

    # ----------------- stage 1: branch convs + partial stats --------------
    y_all, stats, xmean = pl.pallas_call(
        functools.partial(conv_branches_kernel, H=H, W=W, dils=dils,
                          pack_k=pack_k, cin=Cin),
        grid=(N,),
        in_specs=[
            pl.BlockSpec((1, Cin, HW), lambda b: (b, 0, 0)),
            pl.BlockSpec((n_taps, HW), lambda b: (0, 0)),
            pl.BlockSpec((4 * Cout, Kbig), lambda b: (0, 0)),
            pl.BlockSpec((4 * Cout, 1), lambda b: (0, 0)),
        ],
        out_specs=(
            pl.BlockSpec((1, 4 * Cout, HW), lambda b: (b, 0, 0)),
            pl.BlockSpec((1, 4 * Cout, 2), lambda b: (b, 0, 0)),
            pl.BlockSpec((1, Cin, 1), lambda b: (b, 0, 0)),
        ),
        out_shape=(
            jax.ShapeDtypeStruct((N, 4 * Cout, HW), bf16),
            jax.ShapeDtypeStruct((N, 4 * Cout, 2), f32),
            jax.ShapeDtypeStruct((N, Cin, 1), f32),
        ),
        compiler_params=pltpu.CompilerParams(
            dimension_semantics=("parallel",),
            vmem_limit_bytes=64 * 1024 * 1024),
        cost_estimate=pl.CostEstimate(
            flops=2 * N * 4 * Cout * Kbig * HW,
            transcendentals=0,
            bytes_accessed=(4 * N * Cin * HW + 4 * n_taps * HW
                            + 2 * 4 * Cout * Kbig + 2 * N * 4 * Cout * HW)),
    )(x3, masks, wbig, bbig)

    # --------- stage 2: BN scale/shift + global-pool branch (tiny) ---------
    vm = pl.BlockSpec(memory_space=pltpu.MemorySpace.VMEM)
    scale14, shift14, c5 = pl.pallas_call(
        functools.partial(branch_stats_kernel, M=M),
        in_specs=[vm] * 9,
        out_specs=(vm, vm, vm),
        out_shape=(
            jax.ShapeDtypeStruct((4 * Cout, 1), f32),
            jax.ShapeDtypeStruct((4 * Cout, 1), f32),
            jax.ShapeDtypeStruct((N, Cout, 1), f32),
        ),
    )(stats, xmean, g14, be14, w5, col(p["b5"]), col(p["g5"]),
      col(p["be5"]), wcat5)

    # ----- stage 3: per-branch BN+ReLU fused with concat + conv_cat --------
    z, zstats = pl.pallas_call(
        cat_conv_kernel,
        grid=(N, nT),
        in_specs=[
            pl.BlockSpec((1, 4 * Cout, TQ), lambda b, t: (b, 0, t)),
            pl.BlockSpec((4 * Cout, 1), lambda b, t: (0, 0)),
            pl.BlockSpec((4 * Cout, 1), lambda b, t: (0, 0)),
            pl.BlockSpec((Cout, 4 * Cout), lambda b, t: (0, 0)),
            pl.BlockSpec((Cout, 1), lambda b, t: (0, 0)),
            pl.BlockSpec((1, Cout, 1), lambda b, t: (b, 0, 0)),
        ],
        out_specs=(
            pl.BlockSpec((1, Cout, TQ), lambda b, t: (b, 0, t)),
            pl.BlockSpec((1, 1, Cout, 2), lambda b, t: (b, t, 0, 0)),
        ),
        out_shape=(
            jax.ShapeDtypeStruct((N, Cout, HW), bf16),
            jax.ShapeDtypeStruct((N, nT, Cout, 2), f32),
        ),
        compiler_params=pltpu.CompilerParams(
            dimension_semantics=("parallel", "parallel"),
            vmem_limit_bytes=64 * 1024 * 1024),
        cost_estimate=pl.CostEstimate(
            flops=2 * N * Cout * 4 * Cout * HW,
            transcendentals=0,
            bytes_accessed=2 * N * 4 * Cout * HW + 2 * N * Cout * HW),
    )(y_all, scale14, shift14, wcat14, col(p["bcat"]), c5)

    # ---- stage 3.5 (plain jnp): finalize conv_cat BN scale / shift --------
    s = jnp.sum(zstats, axis=(0, 1))                   # (Cout, 2)
    meanc = s[:, 0:1] * (1.0 / M)
    varc = s[:, 1:2] * (1.0 / M) - meanc * meanc
    cs = col(p["gcat"]) * jax.lax.rsqrt(varc + EPS)
    csh = col(p["becat"]) - meanc * cs

    # --------- stage 4: elementwise BN + ReLU, output aliased onto z -------
    out_b = pl.pallas_call(
        cat_bn_relu_kernel,
        grid=(N, nT),
        in_specs=[
            pl.BlockSpec((1, Cout, TQ), lambda b, t: (b, 0, t)),
            pl.BlockSpec((Cout, 1), lambda b, t: (0, 0)),
            pl.BlockSpec((Cout, 1), lambda b, t: (0, 0)),
        ],
        out_specs=pl.BlockSpec((1, Cout, TQ), lambda b, t: (b, 0, t)),
        out_shape=jax.ShapeDtypeStruct((N, Cout, HW), bf16),
        input_output_aliases={0: 0},
        compiler_params=pltpu.CompilerParams(
            dimension_semantics=("parallel", "parallel")),
    )(z, cs, csh)

    return out_b.astype(f32).reshape(N, Cout, H, W)    # already NCHW


# ---------------------------------------------------------------------------
# Pure-JAX reference (for correctness check)
# ---------------------------------------------------------------------------

def aspp_ref(x, p, rate=1):
    hp = jax.lax.Precision.HIGHEST

    def bn(y, g, b):
        mean = jnp.mean(y, axis=(0, 2, 3), keepdims=True)
        var = jnp.mean((y - mean) ** 2, axis=(0, 2, 3), keepdims=True)
        return ((y - mean) * jax.lax.rsqrt(var + EPS) * g.reshape(1, -1, 1, 1)
                + b.reshape(1, -1, 1, 1))

    def conv(y, w, b, pad, dil):
        o = jax.lax.conv_general_dilated(
            y, w, (1, 1), [(pad, pad), (pad, pad)],
            rhs_dilation=(dil, dil),
            dimension_numbers=("NCHW", "OIHW", "NCHW"), precision=hp)
        return o + b.reshape(1, -1, 1, 1)

    relu = lambda t: jnp.maximum(t, 0.0)
    b1 = relu(bn(conv(x, p["W1"], p["b1"], 0, 1), p["g1"], p["be1"]))
    b2 = relu(bn(conv(x, p["W2"], p["b2"], 6 * rate, 6 * rate), p["g2"], p["be2"]))
    b3 = relu(bn(conv(x, p["W3"], p["b3"], 12 * rate, 12 * rate), p["g3"], p["be3"]))
    b4 = relu(bn(conv(x, p["W4"], p["b4"], 18 * rate, 18 * rate), p["g4"], p["be4"]))
    gf = jnp.mean(x, axis=(2, 3), keepdims=True)
    gf = relu(bn(conv(gf, p["W5"], p["b5"], 0, 1), p["g5"], p["be5"]))
    gf = jnp.broadcast_to(gf, (x.shape[0], gf.shape[1], x.shape[2], x.shape[3]))
    cat = jnp.concatenate([b1, b2, b3, b4, gf], axis=1)
    return relu(bn(conv(cat, p["Wcat"], p["bcat"], 0, 1), p["gcat"], p["becat"]))


# ---------------------------------------------------------------------------
# Deterministic parameter init (shapes follow ASPP.__init__)
# ---------------------------------------------------------------------------

def init_params(key, in_chans, out_chans):
    ks = jax.random.split(key, 24)
    nrm = lambda k, shape, s=0.1: s * jax.random.normal(k, shape, jnp.float32)
    gam = lambda k, c: 1.0 + 0.1 * jax.random.normal(k, (c,), jnp.float32)
    p = {}
    p["W1"] = nrm(ks[0], (out_chans, in_chans, 1, 1), 0.3)
    p["b1"] = nrm(ks[1], (out_chans,))
    p["g1"], p["be1"] = gam(ks[2], out_chans), nrm(ks[3], (out_chans,))
    p["W2"] = nrm(ks[4], (out_chans, in_chans, 3, 3), 0.3)
    p["b2"] = nrm(ks[5], (out_chans,))
    p["g2"], p["be2"] = gam(ks[6], out_chans), nrm(ks[7], (out_chans,))
    p["W3"] = nrm(ks[8], (out_chans, in_chans, 3, 3), 0.3)
    p["b3"] = nrm(ks[9], (out_chans,))
    p["g3"], p["be3"] = gam(ks[10], out_chans), nrm(ks[11], (out_chans,))
    p["W4"] = nrm(ks[12], (out_chans, in_chans, 3, 3), 0.3)
    p["b4"] = nrm(ks[13], (out_chans,))
    p["g4"], p["be4"] = gam(ks[14], out_chans), nrm(ks[15], (out_chans,))
    p["W5"] = nrm(ks[16], (out_chans, in_chans, 1, 1), 0.3)
    p["b5"] = nrm(ks[17], (out_chans,))
    p["g5"], p["be5"] = gam(ks[18], out_chans), nrm(ks[19], (out_chans,))
    p["Wcat"] = nrm(ks[20], (out_chans, 5 * out_chans, 1, 1), 0.3)
    p["bcat"] = nrm(ks[21], (out_chans,))
    p["gcat"], p["becat"] = gam(ks[22], out_chans), nrm(ks[23], (out_chans,))
    return p


if __name__ == "__main__":
    key = jax.random.PRNGKey(0)
    kx, kp = jax.random.split(key)

    N, Cin, H, W = 2, 4, 16, 16
    Cout = 16
    x = jax.random.normal(kx, (N, Cin, H, W), jnp.float32)
    params = init_params(kp, Cin, Cout)

    out = jax.jit(lambda xx: aspp_pallas(xx, params))(x)
    out = jax.block_until_ready(out)

    assert out.shape == (N, Cout, H, W), out.shape
    ref = aspp_ref(x, params)
    # bf16 MXU operands + bf16 inter-stage activations (f32 accumulation):
    # compare against the f32 reference with a bf16-appropriate tolerance.
    if not jnp.allclose(out, ref, atol=2e-2, rtol=2e-2):
        raise AssertionError(
            f"mismatch vs reference: max abs err = {jnp.max(jnp.abs(out - ref))}")
    print("KERNEL_OK")
</pallas_src>

<mosaic_0001>
module attributes {stable_mosaic.version = 11 : i64} {
  func.func @cat_conv_kernel(%arg0: i32, %arg1: i32, %arg2: memref<1x64x256xbf16, #tpu.memory_space<vmem>>, %arg3: memref<64x1xf32, #tpu.memory_space<vmem>>, %arg4: memref<64x1xf32, #tpu.memory_space<vmem>>, %arg5: memref<16x64xbf16, #tpu.memory_space<vmem>>, %arg6: memref<16x1xf32, #tpu.memory_space<vmem>>, %arg7: memref<1x16x1xf32, #tpu.memory_space<vmem>>, %arg8: memref<1x16x256xbf16, #tpu.memory_space<vmem>>, %arg9: memref<1x1x16x2xf32, #tpu.memory_space<vmem>>) attributes {dimension_semantics = [#tpu.dimension_semantics<parallel>, #tpu.dimension_semantics<parallel>], iteration_bounds = array<i64: 2, 1>, scalar_prefetch = 0 : i64, scratch_operands = 0 : i64, tpu.core_type = #tpu.core_type<tc>, window_params = [{transform_indices = @transform_0, window_bounds = array<i64: 1, 64, 256>}, {pipeline_mode = #tpu.pipeline_mode<synchronous>, transform_indices = @transform_1, window_bounds = array<i64: 64, 1>}, {pipeline_mode = #tpu.pipeline_mode<synchronous>, transform_indices = @transform_2, window_bounds = array<i64: 64, 1>}, {pipeline_mode = #tpu.pipeline_mode<synchronous>, transform_indices = @transform_3, window_bounds = array<i64: 16, 64>}, {pipeline_mode = #tpu.pipeline_mode<synchronous>, transform_indices = @transform_4, window_bounds = array<i64: 16, 1>}, {transform_indices = @transform_5, window_bounds = array<i64: 1, 16, 1>}, {transform_indices = @transform_6, window_bounds = array<i64: 1, 16, 256>}, {transform_indices = @transform_7, window_bounds = array<i64: 1, 1, 16, 2>}]} {
    %c0 = arith.constant 0 : index
    %c0_0 = arith.constant 0 : index
    %c0_1 = arith.constant 0 : index
    %0 = vector.load %arg2[%c0, %c0_0, %c0_1] : memref<1x64x256xbf16, #tpu.memory_space<vmem>>, vector<1x64x256xbf16>
    %1 = vector.shape_cast %0 : vector<1x64x256xbf16> to vector<64x256xbf16>
    %2 = arith.extf %1 : vector<64x256xbf16> to vector<64x256xf32>
    %c0_2 = arith.constant 0 : index
    %c0_3 = arith.constant 0 : index
    %3 = vector.load %arg3[%c0_2, %c0_3] : memref<64x1xf32, #tpu.memory_space<vmem>>, vector<64x1xf32>
    %4 = vector.broadcast %3 : vector<64x1xf32> to vector<64x256xf32>
    %5 = arith.mulf %2, %4 : vector<64x256xf32>
    %c0_4 = arith.constant 0 : index
    %c0_5 = arith.constant 0 : index
    %6 = vector.load %arg4[%c0_4, %c0_5] : memref<64x1xf32, #tpu.memory_space<vmem>>, vector<64x1xf32>
    %7 = vector.broadcast %6 : vector<64x1xf32> to vector<64x256xf32>
    %8 = arith.addf %5, %7 : vector<64x256xf32>
    %cst = arith.constant 0.000000e+00 : f32
    %9 = vector.broadcast %cst : f32 to vector<64x256xf32>
    %10 = arith.maximumf %8, %9 : vector<64x256xf32>
    %c0_6 = arith.constant 0 : index
    %c0_7 = arith.constant 0 : index
    %11 = vector.load %arg5[%c0_6, %c0_7] : memref<16x64xbf16, #tpu.memory_space<vmem>>, vector<16x64xbf16>
    %12 = arith.truncf %10 : vector<64x256xf32> to vector<64x256xbf16>
    %cst_8 = arith.constant dense<0.000000e+00> : vector<16x256xf32>
    %13 = tpu.matmul %11, %12, %cst_8 {dimension_numbers = #tpu.dot_dimension_numbers<[1], [0], [0], [1], [0, 0, 1, 1], [], []>} : vector<16x64xbf16>, vector<64x256xbf16>, vector<16x256xf32> -> vector<16x256xf32>
    %c0_9 = arith.constant 0 : index
    %c0_10 = arith.constant 0 : index
    %c0_11 = arith.constant 0 : index
    %14 = vector.load %arg7[%c0_9, %c0_10, %c0_11] : memref<1x16x1xf32, #tpu.memory_space<vmem>>, vector<1x16x1xf32>
    %15 = vector.shape_cast %14 : vector<1x16x1xf32> to vector<16x1xf32>
    %16 = vector.broadcast %15 : vector<16x1xf32> to vector<16x256xf32>
    %17 = arith.addf %13, %16 : vector<16x256xf32>
    %c0_12 = arith.constant 0 : index
    %c0_13 = arith.constant 0 : index
    %18 = vector.load %arg6[%c0_12, %c0_13] : memref<16x1xf32, #tpu.memory_space<vmem>>, vector<16x1xf32>
    %19 = vector.broadcast %18 : vector<16x1xf32> to vector<16x256xf32>
    %20 = arith.addf %17, %19 : vector<16x256xf32>
    %21 = arith.truncf %20 : vector<16x256xf32> to vector<16x256xbf16>
    %22 = vector.shape_cast %21 : vector<16x256xbf16> to vector<1x16x256xbf16>
    %c0_14 = arith.constant 0 : index
    %c0_15 = arith.constant 0 : index
    %c0_16 = arith.constant 0 : index
    %23 = vector.load %arg8[%c0_14, %c0_15, %c0_16] : memref<1x16x256xbf16, #tpu.memory_space<vmem>>, vector<1x16x256xbf16>
    tpu.vector_store %arg8[%c0_14, %c0_15, %c0_16], %22 {strides = array<i32>} : memref<1x16x256xbf16, #tpu.memory_space<vmem>>, vector<1x16x256xbf16>,
    %cst_17 = arith.constant dense<0.000000e+00> : vector<16xf32>
    %24 = vector.multi_reduction <add>, %20, %cst_17 [1] : vector<16x256xf32> to vector<16xf32>
    %25 = vector.shape_cast %24 : vector<16xf32> to vector<16x1xf32>
    %26 = arith.mulf %20, %20 : vector<16x256xf32>
    %cst_18 = arith.constant dense<0.000000e+00> : vector<16xf32>
    %27 = vector.multi_reduction <add>, %26, %cst_18 [1] : vector<16x256xf32> to vector<16xf32>
    %28 = vector.shape_cast %27 : vector<16xf32> to vector<16x1xf32>
    %29 = tpu.concatenate %25, %28 in 1 : vector<16x1xf32>, vector<16x1xf32> -> vector<16x2xf32>
    %30 = vector.shape_cast %29 : vector<16x2xf32> to vector<1x1x16x2xf32>
    %c0_19 = arith.constant 0 : index
    %c0_20 = arith.constant 0 : index
    %c0_21 = arith.constant 0 : index
    %c0_22 = arith.constant 0 : index
    %31 = vector.load %arg9[%c0_19, %c0_20, %c0_21, %c0_22] : memref<1x1x16x2xf32, #tpu.memory_space<vmem>>, vector<1x1x16x2xf32>
    tpu.vector_store %arg9[%c0_19, %c0_20, %c0_21, %c0_22], %30 {strides = array<i32>} : memref<1x1x16x2xf32, #tpu.memory_space<vmem>>, vector<1x1x16x2xf32>,
    return
  }
  func.func @transform_0(%arg0: i32, %arg1: i32) -> (i32, i32, i32) {
    %c0_i32 = arith.constant 0 : i32
    %c0_i32_0 = arith.constant 0 : i32
    return %arg0, %c0_i32, %arg1 : i32, i32, i32
  }
  func.func @transform_1(%arg0: i32, %arg1: i32) -> (i32, i32) {
    %c0_i32 = arith.constant 0 : i32
    %c0_i32_0 = arith.constant 0 : i32
    %c0_i32_1 = arith.constant 0 : i32
    return %c0_i32, %c0_i32_0 : i32, i32
  }
  func.func @transform_2(%arg0: i32, %arg1: i32) -> (i32, i32) {
    %c0_i32 = arith.constant 0 : i32
    %c0_i32_0 = arith.constant 0 : i32
    %c0_i32_1 = arith.constant 0 : i32
    return %c0_i32, %c0_i32_0 : i32, i32
  }
  func.func @transform_3(%arg0: i32, %arg1: i32) -> (i32, i32) {
    %c0_i32 = arith.constant 0 : i32
    %c0_i32_0 = arith.constant 0 : i32
    %c0_i32_1 = arith.constant 0 : i32
    return %c0_i32, %c0_i32_0 : i32, i32
  }
  func.func @transform_4(%arg0: i32, %arg1: i32) -> (i32, i32) {
    %c0_i32 = arith.constant 0 : i32
    %c0_i32_0 = arith.constant 0 : i32
    %c0_i32_1 = arith.constant 0 : i32
    return %c0_i32, %c0_i32_0 : i32, i32
  }
  func.func @transform_5(%arg0: i32, %arg1: i32) -> (i32, i32, i32) {
    %c0_i32 = arith.constant 0 : i32
    %c0_i32_0 = arith.constant 0 : i32
    %c0_i32_1 = arith.constant 0 : i32
    return %arg0, %c0_i32, %c0_i32_0 : i32, i32, i32
  }
  func.func @transform_6(%arg0: i32, %arg1: i32) -> (i32, i32, i32) {
    %c0_i32 = arith.constant 0 : i32
    %c0_i32_0 = arith.constant 0 : i32
    return %arg0, %c0_i32, %arg1 : i32, i32, i32
  }
  func.func @transform_7(%arg0: i32, %arg1: i32) -> (i32, i32, i32, i32) {
    %c0_i32 = arith.constant 0 : i32
    %c0_i32_0 = arith.constant 0 : i32
    %c0_i32_1 = arith.constant 0 : i32
    return %arg0, %arg1, %c0_i32, %c0_i32_0 : i32, i32, i32, i32
  }
}

module attributes {stable_mosaic.version = 11 : i64} {
  func.func @conv_branches_kernel(%arg0: i32, %arg1: memref<1x4x256xf32, #tpu.memory_space<vmem>>, %arg2: memref<28x256xf32, #tpu.memory_space<vmem>>, %arg3: memref<64x112xbf16, #tpu.memory_space<vmem>>, %arg4: memref<64x1xf32, #tpu.memory_space<vmem>>, %arg5: memref<1x64x256xbf16, #tpu.memory_space<vmem>>, %arg6: memref<1x64x2xf32, #tpu.memory_space<vmem>>, %arg7: memref<1x4x1xf32, #tpu.memory_space<vmem>>) attributes {dimension_semantics = [#tpu.dimension_semantics<parallel>], iteration_bounds = array<i64: 2>, scalar_prefetch = 0 : i64, scratch_operands = 0 : i64, tpu.core_type = #tpu.core_type<tc>, window_params = [{transform_indices = @transform_0, window_bounds = array<i64: 1, 4, 256>}, {pipeline_mode = #tpu.pipeline_mode<synchronous>, transform_indices = @transform_1, window_bounds = array<i64: 28, 256>}, {pipeline_mode = #tpu.pipeline_mode<synchronous>, transform_indices = @transform_2, window_bounds = array<i64: 64, 112>}, {pipeline_mode = #tpu.pipeline_mode<synchronous>, transform_indices = @transform_3, window_bounds = array<i64: 64, 1>}, {transform_indices = @transform_4, window_bounds = array<i64: 1, 64, 256>}, {transform_indices = @transform_5, window_bounds = array<i64: 1, 64, 2>}, {transform_indices = @transform_6, window_bounds = array<i64: 1, 4, 1>}]} {
    %c0 = arith.constant 0 : index
    %c0_0 = arith.constant 0 : index
    %c0_1 = arith.constant 0 : index
    %0 = vector.load %arg1[%c0, %c0_0, %c0_1] : memref<1x4x256xf32, #tpu.memory_space<vmem>>, vector<1x4x256xf32>
    %1 = vector.shape_cast %0 : vector<1x4x256xf32> to vector<4x256xf32>
    %2 = vector.extract_strided_slice %1 {offsets = [0, 154], sizes = [4, 102], strides = [1, 1]} : vector<4x256xf32> to vector<4x102xf32>
    %3 = vector.extract_strided_slice %1 {offsets = [0, 0], sizes = [4, 154], strides = [1, 1]} : vector<4x256xf32> to vector<4x154xf32>
    %4 = tpu.concatenate %2, %3 in 1 : vector<4x102xf32>, vector<4x154xf32> -> vector<4x256xf32>
    %c1 = arith.constant 1 : index
    %c0_2 = arith.constant 0 : index
    %5 = vector.load %arg2[%c1, %c0_2] : memref<28x256xf32, #tpu.memory_space<vmem>>, vector<1x256xf32>
    %6 = vector.broadcast %5 : vector<1x256xf32> to vector<4x256xf32>
    %7 = arith.mulf %4, %6 : vector<4x256xf32>
    %8 = vector.extract_strided_slice %1 {offsets = [0, 160], sizes = [4, 96], strides = [1, 1]} : vector<4x256xf32> to vector<4x96xf32>
    %9 = vector.extract_strided_slice %1 {offsets = [0, 0], sizes = [4, 160], strides = [1, 1]} : vector<4x256xf32> to vector<4x160xf32>
    %10 = tpu.concatenate %8, %9 in 1 : vector<4x96xf32>, vector<4x160xf32> -> vector<4x256xf32>
    %c2 = arith.constant 2 : index
    %c0_3 = arith.constant 0 : index
    %11 = vector.load %arg2[%c2, %c0_3] : memref<28x256xf32, #tpu.memory_space<vmem>>, vector<1x256xf32>
    %12 = vector.broadcast %11 : vector<1x256xf32> to vector<4x256xf32>
    %13 = arith.mulf %10, %12 : vector<4x256xf32>
    %14 = vector.extract_strided_slice %1 {offsets = [0, 166], sizes = [4, 90], strides = [1, 1]} : vector<4x256xf32> to vector<4x90xf32>
    %15 = vector.extract_strided_slice %1 {offsets = [0, 0], sizes = [4, 166], strides = [1, 1]} : vector<4x256xf32> to vector<4x166xf32>
    %16 = tpu.concatenate %14, %15 in 1 : vector<4x90xf32>, vector<4x166xf32> -> vector<4x256xf32>
    %c3 = arith.constant 3 : index
    %c0_4 = arith.constant 0 : index
    %17 = vector.load %arg2[%c3, %c0_4] : memref<28x256xf32, #tpu.memory_space<vmem>>, vector<1x256xf32>
    %18 = vector.broadcast %17 : vector<1x256xf32> to vector<4x256xf32>
    %19 = arith.mulf %16, %18 : vector<4x256xf32>
    %20 = vector.extract_strided_slice %1 {offsets = [0, 250], sizes = [4, 6], strides = [1, 1]} : vector<4x256xf32> to vector<4x6xf32>
    %21 = vector.extract_strided_slice %1 {offsets = [0, 0], sizes = [4, 250], strides = [1, 1]} : vector<4x256xf32> to vector<4x250xf32>
    %22 = tpu.concatenate %20, %21 in 1 : vector<4x6xf32>, vector<4x250xf32> -> vector<4x256xf32>
    %c4 = arith.constant 4 : index
    %c0_5 = arith.constant 0 : index
    %23 = vector.load %arg2[%c4, %c0_5] : memref<28x256xf32, #tpu.memory_space<vmem>>, vector<1x256xf32>
    %24 = vector.broadcast %23 : vector<1x256xf32> to vector<4x256xf32>
    %25 = arith.mulf %22, %24 : vector<4x256xf32>
    %26 = vector.extract_strided_slice %1 {offsets = [0, 6], sizes = [4, 250], strides = [1, 1]} : vector<4x256xf32> to vector<4x250xf32>
    %27 = vector.extract_strided_slice %1 {offsets = [0, 0], sizes = [4, 6], strides = [1, 1]} : vector<4x256xf32> to vector<4x6xf32>
    %28 = tpu.concatenate %26, %27 in 1 : vector<4x250xf32>, vector<4x6xf32> -> vector<4x256xf32>
    %c6 = arith.constant 6 : index
    %c0_6 = arith.constant 0 : index
    %29 = vector.load %arg2[%c6, %c0_6] : memref<28x256xf32, #tpu.memory_space<vmem>>, vector<1x256xf32>
    %30 = vector.broadcast %29 : vector<1x256xf32> to vector<4x256xf32>
    %31 = arith.mulf %28, %30 : vector<4x256xf32>
    %32 = vector.extract_strided_slice %1 {offsets = [0, 90], sizes = [4, 166], strides = [1, 1]} : vector<4x256xf32> to vector<4x166xf32>
    %33 = vector.extract_strided_slice %1 {offsets = [0, 0], sizes = [4, 90], strides = [1, 1]} : vector<4x256xf32> to vector<4x90xf32>
    %34 = tpu.concatenate %32, %33 in 1 : vector<4x166xf32>, vector<4x90xf32> -> vector<4x256xf32>
    %c7 = arith.constant 7 : index
    %c0_7 = arith.constant 0 : index
    %35 = vector.load %arg2[%c7, %c0_7] : memref<28x256xf32, #tpu.memory_space<vmem>>, vector<1x256xf32>
    %36 = vector.broadcast %35 : vector<1x256xf32> to vector<4x256xf32>
    %37 = arith.mulf %34, %36 : vector<4x256xf32>
    %38 = vector.extract_strided_slice %1 {offsets = [0, 96], sizes = [4, 160], strides = [1, 1]} : vector<4x256xf32> to vector<4x160xf32>
    %39 = vector.extract_strided_slice %1 {offsets = [0, 0], sizes = [4, 96], strides = [1, 1]} : vector<4x256xf32> to vector<4x96xf32>
    %40 = tpu.concatenate %38, %39 in 1 : vector<4x160xf32>, vector<4x96xf32> -> vector<4x256xf32>
    %c8 = arith.constant 8 : index
    %c0_8 = arith.constant 0 : index
    %41 = vector.load %arg2[%c8, %c0_8] : memref<28x256xf32, #tpu.memory_space<vmem>>, vector<1x256xf32>
    %42 = vector.broadcast %41 : vector<1x256xf32> to vector<4x256xf32>
    %43 = arith.mulf %40, %42 : vector<4x256xf32>
    %44 = vector.extract_strided_slice %1 {offsets = [0, 102], sizes = [4, 154], strides = [1, 1]} : vector<4x256xf32> to vector<4x154xf32>
    %45 = vector.extract_strided_slice %1 {offsets = [0, 0], sizes = [4, 102], strides = [1, 1]} : vector<4x256xf32> to vector<4x102xf32>
    %46 = tpu.concatenate %44, %45 in 1 : vector<4x154xf32>, vector<4x102xf32> -> vector<4x256xf32>
    %c9 = arith.constant 9 : index
    %c0_9 = arith.constant 0 : index
    %47 = vector.load %arg2[%c9, %c0_9] : memref<28x256xf32, #tpu.memory_space<vmem>>, vector<1x256xf32>
    %48 = vector.broadcast %47 : vector<1x256xf32> to vector<4x256xf32>
    %49 = arith.mulf %46, %48 : vector<4x256xf32>
    %50 = vector.extract_strided_slice %1 {offsets = [0, 52], sizes = [4, 204], strides = [1, 1]} : vector<4x256xf32> to vector<4x204xf32>
    %51 = vector.extract_strided_slice %1 {offsets = [0, 0], sizes = [4, 52], strides = [1, 1]} : vector<4x256xf32> to vector<4x52xf32>
    %52 = tpu.concatenate %50, %51 in 1 : vector<4x204xf32>, vector<4x52xf32> -> vector<4x256xf32>
    %c10 = arith.constant 10 : index
    %c0_10 = arith.constant 0 : index
    %53 = vector.load %arg2[%c10, %c0_10] : memref<28x256xf32, #tpu.memory_space<vmem>>, vector<1x256xf32>
    %54 = vector.broadcast %53 : vector<1x256xf32> to vector<4x256xf32>
    %55 = arith.mulf %52, %54 : vector<4x256xf32>
    %56 = vector.extract_strided_slice %1 {offsets = [0, 64], sizes = [4, 192], strides = [1, 1]} : vector<4x256xf32> to vector<4x192xf32>
    %57 = vector.extract_strided_slice %1 {offsets = [0, 0], sizes = [4, 64], strides = [1, 1]} : vector<4x256xf32> to vector<4x64xf32>
    %58 = tpu.concatenate %56, %57 in 1 : vector<4x192xf32>, vector<4x64xf32> -> vector<4x256xf32>
    %c11 = arith.constant 11 : index
    %c0_11 = arith.constant 0 : index
    %59 = vector.load %arg2[%c11, %c0_11] : memref<28x256xf32, #tpu.memory_space<vmem>>, vector<1x256xf32>
    %60 = vector.broadcast %59 : vector<1x256xf32> to vector<4x256xf32>
    %61 = arith.mulf %58, %60 : vector<4x256xf32>
    %62 = vector.extract_strided_slice %1 {offsets = [0, 76], sizes = [4, 180], strides = [1, 1]} : vector<4x256xf32> to vector<4x180xf32>
    %63 = vector.extract_strided_slice %1 {offsets = [0, 0], sizes = [4, 76], strides = [1, 1]} : vector<4x256xf32> to vector<4x76xf32>
    %64 = tpu.concatenate %62, %63 in 1 : vector<4x180xf32>, vector<4x76xf32> -> vector<4x256xf32>
    %c12 = arith.constant 12 : index
    %c0_12 = arith.constant 0 : index
    %65 = vector.load %arg2[%c12, %c0_12] : memref<28x256xf32, #tpu.memory_space<vmem>>, vector<1x256xf32>
    %66 = vector.broadcast %65 : vector<1x256xf32> to vector<4x256xf32>
    %67 = arith.mulf %64, %66 : vector<4x256xf32>
    %68 = vector.extract_strided_slice %1 {offsets = [0, 244], sizes = [4, 12], strides = [1, 1]} : vector<4x256xf32> to vector<4x12xf32>
    %69 = vector.extract_strided_slice %1 {offsets = [0, 0], sizes = [4, 244], strides = [1, 1]} : vector<4x256xf32> to vector<4x244xf32>
    %70 = tpu.concatenate %68, %69 in 1 : vector<4x12xf32>, vector<4x244xf32> -> vector<4x256xf32>
    %c13 = arith.constant 13 : index
    %c0_13 = arith.constant 0 : index
    %71 = vector.load %arg2[%c13, %c0_13] : memref<28x256xf32, #tpu.memory_space<vmem>>, vector<1x256xf32>
    %72 = vector.broadcast %71 : vector<1x256xf32> to vector<4x256xf32>
    %73 = arith.mulf %70, %72 : vector<4x256xf32>
    %74 = vector.extract_strided_slice %1 {offsets = [0, 12], sizes = [4, 244], strides = [1, 1]} : vector<4x256xf32> to vector<4x244xf32>
    %75 = vector.extract_strided_slice %1 {offsets = [0, 0], sizes = [4, 12], strides = [1, 1]} : vector<4x256xf32> to vector<4x12xf32>
    %76 = tpu.concatenate %74, %75 in 1 : vector<4x244xf32>, vector<4x12xf32> -> vector<4x256xf32>
    %c15 = arith.constant 15 : index
    %c0_14 = arith.constant 0 : index
    %77 = vector.load %arg2[%c15, %c0_14] : memref<28x256xf32, #tpu.memory_space<vmem>>, vector<1x256xf32>
    %78 = vector.broadcast %77 : vector<1x256xf32> to vector<4x256xf32>
    %79 = arith.mulf %76, %78 : vector<4x256xf32>
    %80 = vector.extract_strided_slice %1 {offsets = [0, 180], sizes = [4, 76], strides = [1, 1]} : vector<4x256xf32> to vector<4x76xf32>
    %81 = vector.extract_strided_slice %1 {offsets = [0, 0], sizes = [4, 180], strides = [1, 1]} : vector<4x256xf32> to vector<4x180xf32>
    %82 = tpu.concatenate %80, %81 in 1 : vector<4x76xf32>, vector<4x180xf32> -> vector<4x256xf32>
    %c16 = arith.constant 16 : index
    %c0_15 = arith.constant 0 : index
    %83 = vector.load %arg2[%c16, %c0_15] : memref<28x256xf32, #tpu.memory_space<vmem>>, vector<1x256xf32>
    %84 = vector.broadcast %83 : vector<1x256xf32> to vector<4x256xf32>
    %85 = arith.mulf %82, %84 : vector<4x256xf32>
    %86 = vector.extract_strided_slice %1 {offsets = [0, 192], sizes = [4, 64], strides = [1, 1]} : vector<4x256xf32> to vector<4x64xf32>
    %87 = vector.extract_strided_slice %1 {offsets = [0, 0], sizes = [4, 192], strides = [1, 1]} : vector<4x256xf32> to vector<4x192xf32>
    %88 = tpu.concatenate %86, %87 in 1 : vector<4x64xf32>, vector<4x192xf32> -> vector<4x256xf32>
    %c17 = arith.constant 17 : index
    %c0_16 = arith.constant 0 : index
    %89 = vector.load %arg2[%c17, %c0_16] : memref<28x256xf32, #tpu.memory_space<vmem>>, vector<1x256xf32>
    %90 = vector.broadcast %89 : vector<1x256xf32> to vector<4x256xf32>
    %91 = arith.mulf %88, %90 : vector<4x256xf32>
    %92 = vector.extract_strided_slice %1 {offsets = [0, 204], sizes = [4, 52], strides = [1, 1]} : vector<4x256xf32> to vector<4x52xf32>
    %93 = vector.extract_strided_slice %1 {offsets = [0, 0], sizes = [4, 204], strides = [1, 1]} : vector<4x256xf32> to vector<4x204xf32>
    %94 = tpu.concatenate %92, %93 in 1 : vector<4x52xf32>, vector<4x204xf32> -> vector<4x256xf32>
    %c18 = arith.constant 18 : index
    %c0_17 = arith.constant 0 : index
    %95 = vector.load %arg2[%c18, %c0_17] : memref<28x256xf32, #tpu.memory_space<vmem>>, vector<1x256xf32>
    %96 = vector.broadcast %95 : vector<1x256xf32> to vector<4x256xf32>
    %97 = arith.mulf %94, %96 : vector<4x256xf32>
    %cst = arith.constant 0.000000e+00 : f32
    %98 = vector.broadcast %cst : f32 to vector<4x256xf32>
    %cst_18 = arith.constant 0.000000e+00 : f32
    %99 = vector.broadcast %cst_18 : f32 to vector<4x256xf32>
    %cst_19 = arith.constant 0.000000e+00 : f32
    %100 = vector.broadcast %cst_19 : f32 to vector<4x256xf32>
    %cst_20 = arith.constant 0.000000e+00 : f32
    %101 = vector.broadcast %cst_20 : f32 to vector<4x256xf32>
    %cst_21 = arith.constant 0.000000e+00 : f32
    %102 = vector.broadcast %cst_21 : f32 to vector<4x256xf32>
    %cst_22 = arith.constant 0.000000e+00 : f32
    %103 = vector.broadcast %cst_22 : f32 to vector<4x256xf32>
    %cst_23 = arith.constant 0.000000e+00 : f32
    %104 = vector.broadcast %cst_23 : f32 to vector<4x256xf32>
    %cst_24 = arith.constant 0.000000e+00 : f32
    %105 = vector.broadcast %cst_24 : f32 to vector<4x256xf32>
    %106 = tpu.concatenate %1, %7, %13, %19, %25, %1, %31, %37, %43, %49, %55, %61, %67, %73, %1, %79 in 0 : vector<4x256xf32>, vector<4x256xf32>, vector<4x256xf32>, vector<4x256xf32>, vector<4x256xf32>, vector<4x256xf32>, vector<4x256xf32>, vector<4x256xf32>, vector<4x256xf32>, vector<4x256xf32>, vector<4x256xf32>, vector<4x256xf32>, vector<4x256xf32>, vector<4x256xf32>, vector<4x256xf32>, vector<4x256xf32> -> vector<64x256xf32>
    %107 = tpu.concatenate %85, %91, %97, %98, %99, %100, %101, %1, %102, %103, %104, %105 in 0 : vector<4x256xf32>, vector<4x256xf32>, vector<4x256xf32>, vector<4x256xf32>, vector<4x256xf32>, vector<4x256xf32>, vector<4x256xf32>, vector<4x256xf32>, vector<4x256xf32>, vector<4x256xf32>, vector<4x256xf32>, vector<4x256xf32> -> vector<48x256xf32>
    %108 = tpu.concatenate %106, %107 in 0 : vector<64x256xf32>, vector<48x256xf32> -> vector<112x256xf32>
    %c0_25 = arith.constant 0 : index
    %c0_26 = arith.constant 0 : index
    %109 = vector.load %arg3[%c0_25, %c0_26] : memref<64x112xbf16, #tpu.memory_space<vmem>>, vector<64x112xbf16>
    %110 = arith.truncf %108 : vector<112x256xf32> to vector<112x256xbf16>
    %cst_27 = arith.constant dense<0.000000e+00> : vector<64x256xf32>
    %111 = tpu.matmul %109, %110, %cst_27 {dimension_numbers = #tpu.dot_dimension_numbers<[1], [0], [0], [1], [0, 0, 1, 1], [], []>} : vector<64x112xbf16>, vector<112x256xbf16>, vector<64x256xf32> -> vector<64x256xf32>
    %c0_28 = arith.constant 0 : index
    %c0_29 = arith.constant 0 : index
    %112 = vector.load %arg4[%c0_28, %c0_29] : memref<64x1xf32, #tpu.memory_space<vmem>>, vector<64x1xf32>
    %113 = vector.broadcast %112 : vector<64x1xf32> to vector<64x256xf32>
    %114 = arith.addf %111, %113 : vector<64x256xf32>
    %115 = arith.truncf %114 : vector<64x256xf32> to vector<64x256xbf16>
    %116 = vector.shape_cast %115 : vector<64x256xbf16> to vector<1x64x256xbf16>
    %c0_30 = arith.constant 0 : index
    %c0_31 = arith.constant 0 : index
    %c0_32 = arith.constant 0 : index
    %117 = vector.load %arg5[%c0_30, %c0_31, %c0_32] : memref<1x64x256xbf16, #tpu.memory_space<vmem>>, vector<1x64x256xbf16>
    tpu.vector_store %arg5[%c0_30, %c0_31, %c0_32], %116 {strides = array<i32>} : memref<1x64x256xbf16, #tpu.memory_space<vmem>>, vector<1x64x256xbf16>,
    %cst_33 = arith.constant dense<0.000000e+00> : vector<64xf32>
    %118 = vector.multi_reduction <add>, %114, %cst_33 [1] : vector<64x256xf32> to vector<64xf32>
    %119 = vector.shape_cast %118 : vector<64xf32> to vector<64x1xf32>
    %120 = arith.mulf %114, %114 : vector<64x256xf32>
    %cst_34 = arith.constant dense<0.000000e+00> : vector<64xf32>
    %121 = vector.multi_reduction <add>, %120, %cst_34 [1] : vector<64x256xf32> to vector<64xf32>
    %122 = vector.shape_cast %121 : vector<64xf32> to vector<64x1xf32>
    %123 = tpu.concatenate %119, %122 in 1 : vector<64x1xf32>, vector<64x1xf32> -> vector<64x2xf32>
    %124 = vector.shape_cast %123 : vector<64x2xf32> to vector<1x64x2xf32>
    %c0_35 = arith.constant 0 : index
    %c0_36 = arith.constant 0 : index
    %c0_37 = arith.constant 0 : index
    %125 = vector.load %arg6[%c0_35, %c0_36, %c0_37] : memref<1x64x2xf32, #tpu.memory_space<vmem>>, vector<1x64x2xf32>
    tpu.vector_store %arg6[%c0_35, %c0_36, %c0_37], %124 {strides = array<i32>} : memref<1x64x2xf32, #tpu.memory_space<vmem>>, vector<1x64x2xf32>,
    %cst_38 = arith.constant dense<0.000000e+00> : vector<4xf32>
    %126 = vector.multi_reduction <add>, %1, %cst_38 [1] : vector<4x256xf32> to vector<4xf32>
    %127 = vector.shape_cast %126 : vector<4xf32> to vector<4x1xf32>
    %cst_39 = arith.constant 3.906250e-03 : f32
    %128 = vector.broadcast %cst_39 : f32 to vector<4x1xf32>
    %129 = arith.mulf %127, %128 : vector<4x1xf32>
    %130 = vector.shape_cast %129 : vector<4x1xf32> to vector<1x4x1xf32>
    %c0_40 = arith.constant 0 : index
    %c0_41 = arith.constant 0 : index
    %c0_42 = arith.constant 0 : index
    %131 = vector.load %arg7[%c0_40, %c0_41, %c0_42] : memref<1x4x1xf32, #tpu.memory_space<vmem>>, vector<1x4x1xf32>
    tpu.vector_store %arg7[%c0_40, %c0_41, %c0_42], %130 {strides = array<i32>} : memref<1x4x1xf32, #tpu.memory_space<vmem>>, vector<1x4x1xf32>,
    return
  }
  func.func @transform_0(%arg0: i32) -> (i32, i32, i32) {
    %c0_i32 = arith.constant 0 : i32
    %c0_i32_0 = arith.constant 0 : i32
    %c0_i32_1 = arith.constant 0 : i32
    return %arg0, %c0_i32, %c0_i32_0 : i32, i32, i32
  }
  func.func @transform_1(%arg0: i32) -> (i32, i32) {
    %c0_i32 = arith.constant 0 : i32
    %c0_i32_0 = arith.constant 0 : i32
    %c0_i32_1 = arith.constant 0 : i32
    return %c0_i32, %c0_i32_0 : i32, i32
  }
  func.func @transform_2(%arg0: i32) -> (i32, i32) {
    %c0_i32 = arith.constant 0 : i32
    %c0_i32_0 = arith.constant 0 : i32
    %c0_i32_1 = arith.constant 0 : i32
    return %c0_i32, %c0_i32_0 : i32, i32
  }
  func.func @transform_3(%arg0: i32) -> (i32, i32) {
    %c0_i32 = arith.constant 0 : i32
    %c0_i32_0 = arith.constant 0 : i32
    %c0_i32_1 = arith.constant 0 : i32
    return %c0_i32, %c0_i32_0 : i32, i32
  }
  func.func @transform_4(%arg0: i32) -> (i32, i32, i32) {
    %c0_i32 = arith.constant 0 : i32
    %c0_i32_0 = arith.constant 0 : i32
    %c0_i32_1 = arith.constant 0 : i32
    return %arg0, %c0_i32, %c0_i32_0 : i32, i32, i32
  }
  func.func @transform_5(%arg0: i32) -> (i32, i32, i32) {
    %c0_i32 = arith.constant 0 : i32
    %c0_i32_0 = arith.constant 0 : i32
    %c0_i32_1 = arith.constant 0 : i32
    return %arg0, %c0_i32, %c0_i32_0 : i32, i32, i32
  }
  func.func @transform_6(%arg0: i32) -> (i32, i32, i32) {
    %c0_i32 = arith.constant 0 : i32
    %c0_i32_0 = arith.constant 0 : i32
    %c0_i32_1 = arith.constant 0 : i32
    return %arg0, %c0_i32, %c0_i32_0 : i32, i32, i32
  }
}

module attributes {stable_mosaic.version = 11 : i64} {
  func.func @branch_stats_kernel(%arg0: memref<2x64x2xf32, #tpu.memory_space<vmem>>, %arg1: memref<2x4x1xf32, #tpu.memory_space<vmem>>, %arg2: memref<64x1xf32, #tpu.memory_space<vmem>>, %arg3: memref<64x1xf32, #tpu.memory_space<vmem>>, %arg4: memref<16x4xf32, #tpu.memory_space<vmem>>, %arg5: memref<16x1xf32, #tpu.memory_space<vmem>>, %arg6: memref<16x1xf32, #tpu.memory_space<vmem>>, %arg7: memref<16x1xf32, #tpu.memory_space<vmem>>, %arg8: memref<16x16xf32, #tpu.memory_space<vmem>>, %arg9: memref<64x1xf32, #tpu.memory_space<vmem>>, %arg10: memref<64x1xf32, #tpu.memory_space<vmem>>, %arg11: memref<2x16x1xf32, #tpu.memory_space<vmem>>) attributes {dimension_semantics = [], scalar_prefetch = 0 : i64, scratch_operands = 0 : i64, tpu.core_type = #tpu.core_type<tc>} {
    %c0 = arith.constant 0 : index
    %c0_0 = arith.constant 0 : index
    %c0_1 = arith.constant 0 : index
    %0 = vector.load %arg0[%c0, %c0_0, %c0_1] : memref<2x64x2xf32, #tpu.memory_space<vmem>>, vector<2x64x2xf32>
    %cst = arith.constant dense<0.000000e+00> : vector<64x2xf32>
    %1 = vector.multi_reduction <add>, %0, %cst [0] : vector<2x64x2xf32> to vector<64x2xf32>
    %2 = vector.extract_strided_slice %1 {offsets = [0, 0], sizes = [64, 1], strides = [1, 1]} : vector<64x2xf32> to vector<64x1xf32>
    %cst_2 = arith.constant 0.001953125 : f32
    %3 = vector.broadcast %cst_2 : f32 to vector<64x1xf32>
    %4 = arith.mulf %2, %3 : vector<64x1xf32>
    %5 = vector.extract_strided_slice %1 {offsets = [0, 1], sizes = [64, 1], strides = [1, 1]} : vector<64x2xf32> to vector<64x1xf32>
    %cst_3 = arith.constant 0.001953125 : f32
    %6 = vector.broadcast %cst_3 : f32 to vector<64x1xf32>
    %7 = arith.mulf %5, %6 : vector<64x1xf32>
    %8 = arith.mulf %4, %4 : vector<64x1xf32>
    %9 = arith.subf %7, %8 : vector<64x1xf32>
    %c0_4 = arith.constant 0 : index
    %c0_5 = arith.constant 0 : index
    %10 = vector.load %arg2[%c0_4, %c0_5] : memref<64x1xf32, #tpu.memory_space<vmem>>, vector<64x1xf32>
    %cst_6 = arith.constant 9.99999974E-6 : f32
    %11 = vector.broadcast %cst_6 : f32 to vector<64x1xf32>
    %12 = arith.addf %9, %11 : vector<64x1xf32>
    %13 = math.rsqrt %12 : vector<64x1xf32>
    %14 = arith.mulf %10, %13 : vector<64x1xf32>
    %c0_7 = arith.constant 0 : index
    %c0_8 = arith.constant 0 : index
    %15 = vector.load %arg9[%c0_7, %c0_8] : memref<64x1xf32, #tpu.memory_space<vmem>>, vector<64x1xf32>
    tpu.vector_store %arg9[%c0_7, %c0_8], %14 {strides = array<i32>} : memref<64x1xf32, #tpu.memory_space<vmem>>, vector<64x1xf32>,
    %c0_9 = arith.constant 0 : index
    %c0_10 = arith.constant 0 : index
    %16 = vector.load %arg3[%c0_9, %c0_10] : memref<64x1xf32, #tpu.memory_space<vmem>>, vector<64x1xf32>
    %17 = arith.mulf %4, %14 : vector<64x1xf32>
    %18 = arith.subf %16, %17 : vector<64x1xf32>
    %c0_11 = arith.constant 0 : index
    %c0_12 = arith.constant 0 : index
    %19 = vector.load %arg10[%c0_11, %c0_12] : memref<64x1xf32, #tpu.memory_space<vmem>>, vector<64x1xf32>
    tpu.vector_store %arg10[%c0_11, %c0_12], %18 {strides = array<i32>} : memref<64x1xf32, #tpu.memory_space<vmem>>, vector<64x1xf32>,
    %c0_13 = arith.constant 0 : index
    %c0_14 = arith.constant 0 : index
    %c0_15 = arith.constant 0 : index
    %20 = vector.load %arg1[%c0_13, %c0_14, %c0_15] : memref<2x4x1xf32, #tpu.memory_space<vmem>>, vector<1x4x1xf32>
    %21 = vector.shape_cast %20 : vector<1x4x1xf32> to vector<4x1xf32>
    %c1 = arith.constant 1 : index
    %c0_16 = arith.constant 0 : index
    %c0_17 = arith.constant 0 : index
    %22 = vector.load %arg1[%c1, %c0_16, %c0_17] : memref<2x4x1xf32, #tpu.memory_space<vmem>>, vector<1x4x1xf32>
    %23 = vector.shape_cast %22 : vector<1x4x1xf32> to vector<4x1xf32>
    %24 = tpu.concatenate %21, %23 in 1 : vector<4x1xf32>, vector<4x1xf32> -> vector<4x2xf32>
    %c0_18 = arith.constant 0 : index
    %c0_19 = arith.constant 0 : index
    %25 = vector.load %arg4[%c0_18, %c0_19] : memref<16x4xf32, #tpu.memory_space<vmem>>, vector<16x4xf32>
    %cst_20 = arith.constant dense<0.000000e+00> : vector<16x2xf32>
    %26 = tpu.matmul %25, %24, %cst_20 {dimension_numbers = #tpu.dot_dimension_numbers<[1], [0], [0], [1], [0, 0, 1, 1], [], []>} : vector<16x4xf32>, vector<4x2xf32>, vector<16x2xf32> -> vector<16x2xf32>
    %c0_21 = arith.constant 0 : index
    %c0_22 = arith.constant 0 : index
    %27 = vector.load %arg5[%c0_21, %c0_22] : memref<16x1xf32, #tpu.memory_space<vmem>>, vector<16x1xf32>
    %28 = vector.broadcast %27 : vector<16x1xf32> to vector<16x2xf32>
    %29 = arith.addf %26, %28 : vector<16x2xf32>
    %cst_23 = arith.constant dense<0.000000e+00> : vector<16xf32>
    %30 = vector.multi_reduction <add>, %29, %cst_23 [1] : vector<16x2xf32> to vector<16xf32>
    %31 = vector.shape_cast %30 : vector<16xf32> to vector<16x1xf32>
    %cst_24 = arith.constant 5.000000e-01 : f32
    %32 = vector.broadcast %cst_24 : f32 to vector<16x1xf32>
    %33 = arith.mulf %31, %32 : vector<16x1xf32>
    %34 = arith.mulf %29, %29 : vector<16x2xf32>
    %cst_25 = arith.constant dense<0.000000e+00> : vector<16xf32>
    %35 = vector.multi_reduction <add>, %34, %cst_25 [1] : vector<16x2xf32> to vector<16xf32>
    %36 = vector.shape_cast %35 : vector<16xf32> to vector<16x1xf32>
    %cst_26 = arith.constant 5.000000e-01 : f32
    %37 = vector.broadcast %cst_26 : f32 to vector<16x1xf32>
    %38 = arith.mulf %36, %37 : vector<16x1xf32>
    %39 = arith.mulf %33, %33 : vector<16x1xf32>
    %40 = arith.subf %38, %39 : vector<16x1xf32>
    %41 = vector.broadcast %33 : vector<16x1xf32> to vector<16x2xf32>
    %42 = arith.subf %29, %41 : vector<16x2xf32>
    %cst_27 = arith.constant 9.99999974E-6 : f32
    %43 = vector.broadcast %cst_27 : f32 to vector<16x1xf32>
    %44 = arith.addf %40, %43 : vector<16x1xf32>
    %45 = math.rsqrt %44 : vector<16x1xf32>
    %46 = vector.broadcast %45 : vector<16x1xf32> to vector<16x2xf32>
    %47 = arith.mulf %42, %46 : vector<16x2xf32>
    %c0_28 = arith.constant 0 : index
    %c0_29 = arith.constant 0 : index
    %48 = vector.load %arg6[%c0_28, %c0_29] : memref<16x1xf32, #tpu.memory_space<vmem>>, vector<16x1xf32>
    %49 = vector.broadcast %48 : vector<16x1xf32> to vector<16x2xf32>
    %50 = arith.mulf %47, %49 : vector<16x2xf32>
    %c0_30 = arith.constant 0 : index
    %c0_31 = arith.constant 0 : index
    %51 = vector.load %arg7[%c0_30, %c0_31] : memref<16x1xf32, #tpu.memory_space<vmem>>, vector<16x1xf32>
    %52 = vector.broadcast %51 : vector<16x1xf32> to vector<16x2xf32>
    %53 = arith.addf %50, %52 : vector<16x2xf32>
    %cst_32 = arith.constant 0.000000e+00 : f32
    %54 = vector.broadcast %cst_32 : f32 to vector<16x2xf32>
    %55 = arith.maximumf %53, %54 : vector<16x2xf32>
    %c0_33 = arith.constant 0 : index
    %c0_34 = arith.constant 0 : index
    %56 = vector.load %arg8[%c0_33, %c0_34] : memref<16x16xf32, #tpu.memory_space<vmem>>, vector<16x16xf32>
    %cst_35 = arith.constant dense<0.000000e+00> : vector<16x2xf32>
    %57 = tpu.matmul %56, %55, %cst_35 {dimension_numbers = #tpu.dot_dimension_numbers<[1], [0], [0], [1], [0, 0, 1, 1], [], []>} : vector<16x16xf32>, vector<16x2xf32>, vector<16x2xf32> -> vector<16x2xf32>
    %58 = vector.extract_strided_slice %57 {offsets = [0, 0], sizes = [16, 1], strides = [1, 1]} : vector<16x2xf32> to vector<16x1xf32>
    %c0_36 = arith.constant 0 : index
    %c0_37 = arith.constant 0 : index
    %c0_38 = arith.constant 0 : index
    %59 = vector.load %arg11[%c0_36, %c0_37, %c0_38] : memref<2x16x1xf32, #tpu.memory_space<vmem>>, vector<1x16x1xf32>
    %60 = vector.shape_cast %59 : vector<1x16x1xf32> to vector<16x1xf32>
    %61 = vector.shape_cast %58 : vector<16x1xf32> to vector<1x16x1xf32>
    tpu.vector_store %arg11[%c0_36, %c0_37, %c0_38], %61 {strides = array<i32>} : memref<2x16x1xf32, #tpu.memory_space<vmem>>, vector<1x16x1xf32>,
    %62 = vector.extract_strided_slice %57 {offsets = [0, 1], sizes = [16, 1], strides = [1, 1]} : vector<16x2xf32> to vector<16x1xf32>
    %c1_39 = arith.constant 1 : index
    %c0_40 = arith.constant 0 : index
    %c0_41 = arith.constant 0 : index
    %63 = vector.load %arg11[%c1_39, %c0_40, %c0_41] : memref<2x16x1xf32, #tpu.memory_space<vmem>>, vector<1x16x1xf32>
    %64 = vector.shape_cast %63 : vector<1x16x1xf32> to vector<16x1xf32>
    %65 = vector.shape_cast %62 : vector<16x1xf32> to vector<1x16x1xf32>
    tpu.vector_store %arg11[%c1_39, %c0_40, %c0_41], %65 {strides = array<i32>} : memref<2x16x1xf32, #tpu.memory_space<vmem>>, vector<1x16x1xf32>,
    return
  }
}

module attributes {stable_mosaic.version = 11 : i64} {
  func.func @cat_bn_relu_kernel(%arg0: i32, %arg1: i32, %arg2: memref<1x16x256xbf16, #tpu.memory_space<vmem>>, %arg3: memref<16x1xf32, #tpu.memory_space<vmem>>, %arg4: memref<16x1xf32, #tpu.memory_space<vmem>>, %arg5: memref<1x16x256xbf16, #tpu.memory_space<vmem>>) attributes {dimension_semantics = [#tpu.dimension_semantics<parallel>, #tpu.dimension_semantics<parallel>], iteration_bounds = array<i64: 2, 1>, scalar_prefetch = 0 : i64, scratch_operands = 0 : i64, tpu.core_type = #tpu.core_type<tc>, window_params = [{transform_indices = @transform_0, window_bounds = array<i64: 1, 16, 256>}, {pipeline_mode = #tpu.pipeline_mode<synchronous>, transform_indices = @transform_1, window_bounds = array<i64: 16, 1>}, {pipeline_mode = #tpu.pipeline_mode<synchronous>, transform_indices = @transform_2, window_bounds = array<i64: 16, 1>}, {transform_indices = @transform_3, window_bounds = array<i64: 1, 16, 256>}]} {
    %c0 = arith.constant 0 : index
    %c0_0 = arith.constant 0 : index
    %c0_1 = arith.constant 0 : index
    %0 = vector.load %arg2[%c0, %c0_0, %c0_1] : memref<1x16x256xbf16, #tpu.memory_space<vmem>>, vector<1x16x256xbf16>
    %1 = vector.shape_cast %0 : vector<1x16x256xbf16> to vector<16x256xbf16>
    %2 = arith.extf %1 : vector<16x256xbf16> to vector<16x256xf32>
    %c0_2 = arith.constant 0 : index
    %c0_3 = arith.constant 0 : index
    %3 = vector.load %arg3[%c0_2, %c0_3] : memref<16x1xf32, #tpu.memory_space<vmem>>, vector<16x1xf32>
    %4 = vector.broadcast %3 : vector<16x1xf32> to vector<16x256xf32>
    %5 = arith.mulf %2, %4 : vector<16x256xf32>
    %c0_4 = arith.constant 0 : index
    %c0_5 = arith.constant 0 : index
    %6 = vector.load %arg4[%c0_4, %c0_5] : memref<16x1xf32, #tpu.memory_space<vmem>>, vector<16x1xf32>
    %7 = vector.broadcast %6 : vector<16x1xf32> to vector<16x256xf32>
    %8 = arith.addf %5, %7 : vector<16x256xf32>
    %cst = arith.constant 0.000000e+00 : f32
    %9 = vector.broadcast %cst : f32 to vector<16x256xf32>
    %10 = arith.maximumf %8, %9 : vector<16x256xf32>
    %11 = arith.truncf %10 : vector<16x256xf32> to vector<16x256xbf16>
    %12 = vector.shape_cast %11 : vector<16x256xbf16> to vector<1x16x256xbf16>
    %c0_6 = arith.constant 0 : index
    %c0_7 = arith.constant 0 : index
    %c0_8 = arith.constant 0 : index
    %13 = vector.load %arg5[%c0_6, %c0_7, %c0_8] : memref<1x16x256xbf16, #tpu.memory_space<vmem>>, vector<1x16x256xbf16>
    tpu.vector_store %arg5[%c0_6, %c0_7, %c0_8], %12 {strides = array<i32>} : memref<1x16x256xbf16, #tpu.memory_space<vmem>>, vector<1x16x256xbf16>,
    return
  }
  func.func @transform_0(%arg0: i32, %arg1: i32) -> (i32, i32, i32) {
    %c0_i32 = arith.constant 0 : i32
    %c0_i32_0 = arith.constant 0 : i32
    return %arg0, %c0_i32, %arg1 : i32, i32, i32
  }
  func.func @transform_1(%arg0: i32, %arg1: i32) -> (i32, i32) {
    %c0_i32 = arith.constant 0 : i32
    %c0_i32_0 = arith.constant 0 : i32
    %c0_i32_1 = arith.constant 0 : i32
    return %c0_i32, %c0_i32_0 : i32, i32
  }
  func.func @transform_2(%arg0: i32, %arg1: i32) -> (i32, i32) {
    %c0_i32 = arith.constant 0 : i32
    %c0_i32_0 = arith.constant 0 : i32
    %c0_i32_1 = arith.constant 0 : i32
    return %c0_i32, %c0_i32_0 : i32, i32
  }
  func.func @transform_3(%arg0: i32, %arg1: i32) -> (i32, i32, i32) {
    %c0_i32 = arith.constant 0 : i32
    %c0_i32_0 = arith.constant 0 : i32
    return %arg0, %c0_i32, %arg1 : i32, i32, i32
  }
}

</mosaic_0001>

<bundles_post_ra>
// kernel: _lambda_.5
= control target key start
LH: loop header
LB: loop body
LE: loop exit
PB: predicated region body
PF: predicated region fallthrough
CT: control target
= control target key end

     0   :  { %17 = vsyncpa [#allocation3], 0  ;;  %s1021_s0 = inlined_call_operand.vmem [shape: f32[2,64,2], index: 0, kind: input, shape index: {}]   ;;  %s1022_s1 = inlined_call_operand.vmem [shape: f32[2,4,1], index: 1, kind: input, shape index: {}]   ;;  %s1023_s2 = inlined_call_operand.vmem [shape: f32[64,1], index: 2, kind: input, shape index: {}]   ;;  %s1024_s3 = inlined_call_operand.vmem [shape: f32[64,1], index: 3, kind: input, shape index: {}]   ;;  %s1025_s4 = inlined_call_operand.vmem [shape: f32[16,4], index: 4, kind: input, shape index: {}]   ;;  %s1026_s5 = inlined_call_operand.vmem [shape: f32[16,1], index: 5, kind: input, shape index: {}]   ;;  %s1027_s6 = inlined_call_operand.hbm [shape: f32[16,1], index: 6, kind: input, shape index: {}]   ;;  %s1028_s7 = inlined_call_operand.hbm [shape: f32[16,1], index: 7, kind: input, shape index: {}]   ;;  %s1029_s8 = inlined_call_operand.vmem [shape: f32[16,16], index: 8, kind: input, shape index: {}]   ;;  %s1030_s9 = inlined_call_operand.vmem [shape: f32[64,1], index: 9, kind: output, shape index: {0}]   ;;  %s1031_s10 = inlined_call_operand.vmem [shape: f32[64,1], index: 10, kind: output, shape index: {1}]   ;;  %s1032_s11 = inlined_call_operand.vmem [shape: f32[2,16,1], index: 11, kind: output, shape index: {2}]  }
   0x1   :  { %18 = vsyncpa [#allocation5], 0  ;;  %s644_s17 = smov [#allocation2]  }
   0x2   :  { %s36_s18 = sshll.u32 %s644_s17, 4  ;;  %s37_s18 = int_to_ptr.vmem [resolvable:$true] %s36_s18 }
   0x3   :  { %s608_s19 = scalar_lea.vmem %s37_s18, 256  ;;  %p613_p1 = scmp.lt.s32.totalorder %s37_s18, %s37_s18 }
   0x4   :  { %p609_p0 = scmp.ne.s32.totalorder %s37_s18, %s608_s19  ;;  %p614_p2 = scmp.lt.s32.totalorder %s608_s19, %s608_s19 }
   0x6   :  { %p615_p3 = por %p614_p2, %p613_p1 }
   0x8   :  { %p616_p4 = pnand %p615_p3, %p609_p0 }
   0xa   :  { %619 = shalt.err (!%p616_p4)
}
   0xb   :  { %s645_s20 = smov 128   ;;  %s646_s21 = smov 8  }
   0xc   :  { %42 = dma.hbm_to_vmem [thread:$0]  %s1027_s6, 256, %s37_s18, [#allocation3], %s645_s20, %s645_s20, %s646_s21  }
   0xd   :  { %s647_s24 = smov [#allocation4]  }
   0xe   :  { %s48_s25 = sshll.u32 %s647_s24, 4  ;;  %s49_s25 = int_to_ptr.vmem [resolvable:$true] %s48_s25 }
   0xf   :  { %s628_s26 = scalar_lea.vmem %s49_s25, 256  ;;  %p633_p6 = scmp.lt.s32.totalorder %s49_s25, %s49_s25 }
  0x10   :  { %p629_p5 = scmp.ne.s32.totalorder %s49_s25, %s628_s26  ;;  %p634_p7 = scmp.lt.s32.totalorder %s628_s26, %s628_s26 }
  0x12   :  { %p635_p8 = por %p634_p7, %p633_p6 }
  0x14   :  { %p636_p9 = pnand %p635_p8, %p629_p5 }
  0x16   :  { %639 = shalt.err (!%p636_p9)
}
  0x17   :  { %54 = dma.hbm_to_vmem [thread:$0]  %s1028_s7, 256, %s49_s25, [#allocation5], %s645_s20, %s645_s20, %s646_s21  }
  0x18   :  { %640 = dma.done.wait [#allocation3], 256  }
  0x19   :  { %641 = vsyncadd [#allocation3], 4294967040 }
  0x1a   :  { %642 = dma.done.wait [#allocation5], 256  }
  0x1b   :  { %643 = vsyncadd [#allocation5], 4294967040  ;;  %v648_v0 = vmov 0   ;;  %vm287_vm0 = vcmask 31744   ;;  %v544_v1 = vld [vmem:[%s1022_s1 + $0x4] sm:$0xf] }
  0x1c   :  { %579 = vset.pattern.permute.xlu1 %v648_v0  ;;  %578 = vset.pattern.permute.xlu0 %v648_v0  ;;  %v273_v2 = vld [vmem:[%s1025_s4] sm:$0xff]  ;;  %s649_s13 = smov 1   ;;  %v276_v4 = vld [vmem:[%s1026_s5 + $0x8] sm:$0xff]  ;;  %vm224_vm1 = vcmask 7168   ;;  %vm294_vm2 = vcmask 1043456   ;;  %vm79_vm3 = vcmask 15360  }
  0x1d   :  { %269 = vrot.lane.b32.xlu0 %v544_v1, %s649_s13  ;;  %561 = vmatprep.mubr.msk.f32.mxu0 %vm287_vm0, %v273_v2  ;;  %v275_v3 = vld [vmem:[%s1026_s5] sm:$0xff]  ;;  %v404_v5 = vld [vmem:[#allocation2 + $0x8] sm:$0xff]  ;;  %v418_v22 = vld [vmem:[#allocation4 + $0x8] sm:$0xff]  ;;  %vm435_vm4 = vcmask 130048  }
  0x1e   :  { %279 = vperm.xlu1 %579, %v275_v3   ;;  %v265_v6 = vld [vmem:[%s1022_s1] sm:$0xf]  ;;  %v274_v9 = vld [vmem:[%s1025_s4 + $0x8] sm:$0xff]  ;;  %v417_v23 = vld [vmem:[#allocation4] sm:$0xff] }
  0x1f   :  { %v403_v24 = vld [vmem:[#allocation2] sm:$0xff]  ;;  %v64_v26 = vld [vmem:[%s1021_s0 + $0x8] sm:$0xff]  ;;  %v66_v33 = vld [vmem:[%s1021_s0 + $0x18] sm:$0xff] }
  0x20   :  { %v433_v25 = vld [vmem:[%s1029_s8] sm:$0xff]  ;;  %v72_v27 = vld [vmem:[%s1021_s0 + $0x48] sm:$0xff]  ;;  %v83_v29 = vsel %vm79_vm3, %v64_v26, 0.0  ;;  %v74_v34 = vld [vmem:[%s1021_s0 + $0x58] sm:$0xff]  ;;  %v89_v37 = vsel %vm79_vm3, %v66_v33, 0.0 }
  0x21   :  { %284 = vperm.xlu0 %578, %v276_v4   ;;  %568 = vmatprep.mubr.msk.f32.mxu1 %vm435_vm4, %v433_v25  ;;  %v63_v28 = vld [vmem:[%s1021_s0] sm:$0xff]  ;;  %v84_v30 = vsel %vm79_vm3, %v72_v27, 0.0  ;;  %v90_v38 = vsel %vm79_vm3, %v74_v34, 0.0  ;;  %v65_v39 = vld [vmem:[%s1021_s0 + $0x10] sm:$0xff]  ;;  %v68_v41 = vld [vmem:[%s1021_s0 + $0x28] sm:$0xff] }
  0x22   :  { %412 = vperm.xlu1 %579, %v404_v5   ;;  %v71_v31 = vld [vmem:[%s1021_s0 + $0x40] sm:$0xff]  ;;  %v80_v32 = vsel %vm79_vm3, %v63_v28, 0.0  ;;  %v85_v35 = vadd.f32 %v84_v30, %v83_v29  ;;  %v73_v40 = vld [vmem:[%s1021_s0 + $0x50] sm:$0xff]  ;;  %v91_v43 = vadd.f32 %v90_v38, %v89_v37  ;;  %v86_v44 = vsel %vm79_vm3, %v65_v39, 0.0  ;;  %v76_v46 = vld [vmem:[%s1021_s0 + $0x68] sm:$0xff] }
  0x23   :  { %v81_v36 = vsel %vm79_vm3, %v71_v31, 0.0  ;;  %v87_v45 = vsel %vm79_vm3, %v73_v40, 0.0  ;;  %v67_v47 = vld [vmem:[%s1021_s0 + $0x20] sm:$0xff]  ;;  %v95_v51 = vsel %vm79_vm3, %v68_v41, 0.0  ;;  %v96_v52 = vsel %vm79_vm3, %v76_v46, 0.0  ;;  %v70_v53 = vld [vmem:[%s1021_s0 + $0x38] sm:$0xff] }
  0x24   :  { %v82_v42 = vadd.f32 %v81_v36, %v80_v32  ;;  %v75_v48 = vld [vmem:[%s1021_s0 + $0x60] sm:$0xff]  ;;  %v801_v49 = vmul.f32 0.001953125, %v85_v35  ;;  %v88_v50 = vadd.f32 %v87_v45, %v86_v44  ;;  %v810_v55 = vmul.f32 0.001953125, %v91_v43  ;;  %v78_v58 = vld [vmem:[%s1021_s0 + $0x78] sm:$0xff]  ;;  %v69_v59 = vld [vmem:[%s1021_s0 + $0x30] sm:$0xff] }
  0x25   :  { %v97_v56 = vadd.f32 %v96_v52, %v95_v51  ;;  %v92_v57 = vsel %vm79_vm3, %v67_v47, 0.0  ;;  %v77_v60 = vld [vmem:[%s1021_s0 + $0x70] sm:$0xff]  ;;  %v93_v63 = vsel %vm79_vm3, %v75_v48, 0.0  ;;  %v101_v0 = vsel %vm79_vm3, %v70_v53, 0.0 }
  0x26   :  { %v808_v54 = vmul.f32 0.001953125, %v82_v42  ;;  %v113_v61 = vmul.f32 %v801_v49, %v801_v49  ;;  %v824_v62 = vmul.f32 0.001953125, %v88_v50  ;;  %v115_v2 = vmul.f32 %v810_v55, %v810_v55 }
  0x27   :  { %v94_v3 = vadd.f32 %v93_v63, %v92_v57  ;;  %v833_v4 = vmul.f32 0.001953125, %v97_v56  ;;  %v102_v5 = vsel %vm79_vm3, %v78_v58, 0.0 }
  0x28   :  { %v112_v1 = vmul.f32 %v808_v54, %v808_v54 }
  0x8f   :  { %v270_v7 = vpop.permute.xlu0 %269 }
  0x90   :  { %v272_v8 = vsel %vm224_vm1, %v265_v6, %v270_v7  ;;  %v98_v6 = vsel %vm79_vm3, %v69_v59, 0.0  ;;  %v99_v7 = vsel %vm79_vm3, %v77_v60, 0.0 }
  0x91   :  { %559 = vmatprep.subr.msk.mxu0 %vm294_vm2, %v272_v8 }
  0x92   :  { %560 = vmatpush3.msk.msra.mxu0 %vm294_vm2, %v272_v8  ;;  %v114_v8 = vmul.f32 %v824_v62, %v824_v62 }
  0x93   :  { %562 = vmatmul.mubr.msk.f32.vlgmr.msra.gmra.mxu0 %vm287_vm0, %v274_v9  ;;  %v841_v9 = vmul.f32 0.001953125, %v94_v3 }
  0x99   :  { %v280_v13 = vpop.permute.xlu1 %279 }
  0x9c   :  { %v285_v10 = vpop.permute.xlu0 %284 }
 0x153   :  { %v563_v11 = vpop.f32.mrf.mxu0 }
 0x154   :  { %v739_v12 = vadd.f32 %v563_v11, %v285_v10  ;;  %v103_v10 = vadd.f32 %v102_v5, %v101_v0  ;;  %v100_v11 = vadd.f32 %v99_v7, %v98_v6 }
 0x155   :  { %v364_v14 = vpop.f32.mrf.mxu0 }
 0x156   :  { %v741_v15 = vadd.f32 %v364_v14, %v280_v13  ;;  %v376_v16 = vsel %vm79_vm3, %v739_v12, 0.0  ;;  %v382_v17 = vmul.f32 %v739_v12, %v739_v12  ;;  %v117_v13 = vmul.f32 %v833_v4, %v833_v4 }
 0x157   :  { %377 = vadd.xlane.f32.xlu1 %v376_v16  ;;  %v846_v14 = vmul.f32 0.001953125, %v103_v10  ;;  %v116_v16 = vmul.f32 %v841_v9, %v841_v9 }
 0x158   :  { %v373_v18 = vsel %vm79_vm3, %v741_v15, 0.0  ;;  %v381_v19 = vmul.f32 %v741_v15, %v741_v15  ;;  %v386_v20 = vsel %vm79_vm3, %v382_v17, 0.0  ;;  %v851_v17 = vmul.f32 0.001953125, %v100_v11 }
 0x159   :  { %374 = vadd.xlane.f32.xlu0 %v373_v18  ;;  %v119_v18 = vmul.f32 %v846_v14, %v846_v14 }
 0x15a   :  { %v383_v21 = vsel %vm79_vm3, %v381_v19, 0.0  ;;  %v118_v19 = vmul.f32 %v851_v17, %v851_v17 }
 0x15b   :  { %387 = vadd.xlane.f32.xlu1 %v386_v20  ;;  %v413_v20 = vpop.permute.xlu1 %412 }
 0x15d   :  { %384 = vadd.xlane.f32.xlu0 %v383_v21 }
 0x16c   :  { %426 = vperm.xlu1 %579, %v418_v22  }
 0x170   :  { %421 = vperm.xlu1 %579, %v417_v23  }
 0x173   :  { %407 = vperm.xlu0 %578, %v403_v24  }
 0x174   :  { %130 = vrot.lane.b32.xlu1 %v113_v61, %s649_s13 }
 0x177   :  { %128 = vrot.lane.b32.xlu0 %v112_v1, %s649_s13 }
 0x178   :  { %134 = vrot.lane.b32.xlu1 %v115_v2, %s649_s13 }
 0x17b   :  { %132 = vrot.lane.b32.xlu0 %v114_v8, %s649_s13 }
 0x17c   :  { %138 = vrot.lane.b32.xlu1 %v117_v13, %s649_s13 }
 0x17f   :  { %136 = vrot.lane.b32.xlu0 %v116_v16, %s649_s13 }
 0x180   :  { %142 = vrot.lane.b32.xlu1 %v119_v18, %s649_s13 }
 0x183   :  { %140 = vrot.lane.b32.xlu0 %v118_v19, %s649_s13 }
 0x1e0   :  { %v378_v21 = vpop.xlane.xlu1 %377 }
 0x1e1   :  { %v380_v22 = vmul.f32 0.5, %v378_v21 }
 0x1e2   :  { %v375_v23 = vpop.xlane.xlu0 %374 }
 0x1e3   :  { %v379_v24 = vmul.f32 0.5, %v375_v23  ;;  %v392_v26 = vmul.f32 %v380_v22, %v380_v22  ;;  %v396_v36 = vsub.f32 %v739_v12, %v380_v22 }
 0x1e4   :  { %v388_v25 = vpop.xlane.xlu1 %387 }
 0x1e5   :  { %v390_v27 = vmul.f32 0.5, %v388_v25  ;;  %v391_v29 = vmul.f32 %v379_v24, %v379_v24  ;;  %v395_v38 = vsub.f32 %v741_v15, %v379_v24  ;;  %v434_v15 = vld [vmem:[%s1029_s8 + $0x8] sm:$0xff]  ;;  %s650_s8 = smov 127  }
 0x1e6   :  { %v385_v28 = vpop.xlane.xlu0 %384 }
 0x1e7   :  { %v394_v30 = vsub.f32 %v390_v27, %v392_v26  ;;  %v389_v31 = vmul.f32 0.5, %v385_v28  ;;  %v161_v27 = vld [vmem:[%s1023_s2 + $0x8] sm:$0xff]  ;;  %v160_v28 = vld [vmem:[%s1023_s2] sm:$0xff] }
 0x1e8   :  { %v427_v35 = vpop.permute.xlu1 %426 }
 0x1e9   :  { %v398_v32 = vadd.f32 1e-05, %v394_v30  ;;  %v393_v33 = vsub.f32 %v389_v31, %v391_v29 }
 0x1eb   :  { %580 = vrsqrt.f32 %v398_v32  ;;  %v397_v34 = vadd.f32 1e-05, %v393_v33  ;;  %v234_v32 = vld [vmem:[%s1024_s3 + $0x8] sm:$0xff] }
 0x1ec   :  { %v422_v42 = vpop.permute.xlu1 %421 }
 0x1ed   :  { %582 = vrsqrt.f32 %v397_v34  ;;  %v163_v34 = vld [vmem:[%s1023_s2 + $0x18] sm:$0xff] }
 0x1ee   :  { %v408_v44 = vpop.permute.xlu0 %407 }
 0x1f0   :  { %v131_v50 = vpop.permute.xlu1 %130 }
 0x1f1   :  { %v153_v51 = vsub.f32 %v801_v49, %v131_v50 }
 0x1f2   :  { %v129_v52 = vpop.permute.xlu0 %128 }
 0x1f3   :  { %v152_v12 = vsub.f32 %v808_v54, %v129_v52  ;;  %v169_v56 = vadd.f32 1e-05, %v153_v51 }
 0x1f4   :  { %v135_v58 = vpop.permute.xlu1 %134 }
 0x1f5   :  { %v168_v57 = vadd.f32 1e-05, %v152_v12  ;;  %584 = vrsqrt.f32 %v169_v56  ;;  %v155_v59 = vsub.f32 %v810_v55, %v135_v58  ;;  %v238_v12 = vld [vmem:[%s1024_s3 + $0x28] sm:$0xff]  ;;  %v167_v56 = vld [vmem:[%s1023_s2 + $0x38] sm:$0xff]  ;;  %v166_v58 = vld [vmem:[%s1023_s2 + $0x30] sm:$0xff] }
 0x1f6   :  { %v133_v60 = vpop.permute.xlu0 %132 }
 0x1f7   :  { %586 = vrsqrt.f32 %v168_v57  ;;  %v154_v61 = vsub.f32 %v824_v62, %v133_v60  ;;  %v171_v63 = vadd.f32 1e-05, %v155_v59  ;;  %v237_v57 = vld [vmem:[%s1024_s3 + $0x20] sm:$0xff] }
 0x1f8   :  { %v581_v37 = vpop.eup %580  ;;  %v139_v1 = vpop.permute.xlu1 %138 }
 0x1f9   :  { %v402_v39 = vmul.f32 %v581_v37, %v396_v36  ;;  %v170_v0 = vadd.f32 1e-05, %v154_v61  ;;  %588 = vrsqrt.f32 %v171_v63  ;;  %v157_v2 = vsub.f32 %v833_v4, %v139_v1  ;;  %v233_v36 = vld [vmem:[%s1024_s3] sm:$0xff]  ;;  %v162_v37 = vld [vmem:[%s1023_s2 + $0x10] sm:$0xff]  ;;  %v240_v1 = vld [vmem:[%s1024_s3 + $0x38] sm:$0xff] }
 0x1fa   :  { %v583_v40 = vpop.eup %582  ;;  %v137_v3 = vpop.permute.xlu0 %136 }
 0x1fb   :  { %v416_v41 = vmul.f32 %v413_v20, %v402_v39  ;;  %v401_v43 = vmul.f32 %v583_v40, %v395_v38  ;;  %590 = vrsqrt.f32 %v170_v0  ;;  %v156_v5 = vsub.f32 %v841_v9, %v137_v3  ;;  %v239_v3 = vld [vmem:[%s1024_s3 + $0x30] sm:$0xff] }
 0x1fc   :  { %v173_v6 = vadd.f32 1e-05, %v157_v2  ;;  %v143_v8 = vpop.permute.xlu1 %142 }
 0x1fd   :  { %v430_v45 = vadd.f32 %v427_v35, %v416_v41  ;;  %v415_v46 = vmul.f32 %v408_v44, %v401_v43  ;;  %v172_v7 = vadd.f32 1e-05, %v156_v5  ;;  %v159_v10 = vsub.f32 %v846_v14, %v143_v8  ;;  %v236_v43 = vld [vmem:[%s1024_s3 + $0x18] sm:$0xff] }
 0x1fe   :  { %592 = vrsqrt.f32 %v173_v6  ;;  %v141_v11 = vpop.permute.xlu0 %140 }
 0x1ff   :  { %v432_v47 = vmax.f32 %v430_v45, 0.0  ;;  %v429_v48 = vadd.f32 %v422_v42, %v415_v46  ;;  %594 = vrsqrt.f32 %v172_v7  ;;  %v158_v13 = vsub.f32 %v851_v17, %v141_v11  ;;  %v165_v45 = vld [vmem:[%s1023_s2 + $0x28] sm:$0xff]  ;;  %v235_v46 = vld [vmem:[%s1024_s3 + $0x10] sm:$0xff] }
 0x200   :  { %v175_v16 = vadd.f32 1e-05, %v159_v10 }
 0x201   :  { %v431_v53 = vmax.f32 %v429_v48, 0.0  ;;  %564 = vmatprep.subr.mxu1 %v432_v47  ;;  %v174_v18 = vadd.f32 1e-05, %v158_v13 }
 0x202   :  { %565 = vmatpush3.msra.mxu1 %v432_v47  ;;  %596 = vrsqrt.f32 %v175_v16  ;;  %v585_v19 = vpop.eup %584  ;;  %v164_v47 = vld [vmem:[%s1023_s2 + $0x20] sm:$0xff] }
 0x203   :  { %566 = vmatprep.subr.mxu1 %v431_v53  ;;  %598 = vrsqrt.f32 %v174_v18  ;;  %194 = vrot.lane.b32.xlu1 %v585_v19, %s650_s8 }
 0x204   :  { %567 = vmatpush3.msra.mxu1 %v431_v53  ;;  %v587_v20 = vpop.eup %586 }
 0x205   :  { %569 = vmatmul.mubr.msk.f32.vlgmr.msra.gmra.mxu1 %vm435_vm4, %v434_v15  ;;  %192 = vrot.lane.b32.xlu0 %v587_v20, %s650_s8 }
 0x206   :  { %v589_v21 = vpop.eup %588 }
 0x207   :  { %198 = vrot.lane.b32.xlu1 %v589_v21, %s650_s8 }
 0x208   :  { %v591_v22 = vpop.eup %590 }
 0x209   :  { %196 = vrot.lane.b32.xlu0 %v591_v22, %s650_s8 }
 0x20b   :  { %v593_v23 = vpop.eup %592 }
 0x20c   :  { %v595_v24 = vpop.eup %594  ;;  %202 = vrot.lane.b32.xlu1 %v593_v23, %s650_s8 }
 0x20d   :  { %200 = vrot.lane.b32.xlu0 %v595_v24, %s650_s8 }
 0x20f   :  { %v597_v25 = vpop.eup %596 }
 0x210   :  { %v599_v26 = vpop.eup %598  ;;  %206 = vrot.lane.b32.xlu1 %v597_v25, %s650_s8 }
 0x211   :  { %204 = vrot.lane.b32.xlu0 %v599_v26, %s650_s8 }
 0x275   :  { %v195_v29 = vpop.permute.xlu1 %194 }
 0x276   :  { %v217_v30 = vmul.f32 %v195_v29, %v161_v27 }
 0x277   :  { %v193_v31 = vpop.permute.xlu0 %192 }
 0x278   :  { %v216_v33 = vmul.f32 %v193_v31, %v160_v28  ;;  %226 = vst.msk [vmem:[%s1030_s9 + $0x8] sm:$0xff] %vm224_vm1, %v217_v30  ;;  %v242_v35 = vmul.f32 %v217_v30, %v801_v49 }
 0x279   :  { %v199_v39 = vpop.permute.xlu1 %198 }
 0x27a   :  { %225 = vst.msk [vmem:[%s1030_s9] sm:$0xff] %vm224_vm1, %v216_v33  ;;  %v241_v38 = vmul.f32 %v216_v33, %v808_v54  ;;  %v250_v40 = vsub.f32 %v234_v32, %v242_v35  ;;  %v219_v41 = vmul.f32 %v199_v39, %v163_v34 }
 0x27b   :  { %v197_v42 = vpop.permute.xlu0 %196 }
 0x27c   :  { %v249_v49 = vsub.f32 %v233_v36, %v241_v38  ;;  %v218_v44 = vmul.f32 %v197_v42, %v162_v37  ;;  %258 = vst.msk [vmem:[%s1031_s10 + $0x8] sm:$0xff] %vm224_vm1, %v250_v40  ;;  %228 = vst.msk [vmem:[%s1030_s9 + $0x18] sm:$0xff] %vm224_vm1, %v219_v41  ;;  %v244_v54 = vmul.f32 %v219_v41, %v810_v55 }
 0x27e   :  { %257 = vst.msk [vmem:[%s1031_s10] sm:$0xff] %vm224_vm1, %v249_v49  ;;  %227 = vst.msk [vmem:[%s1030_s9 + $0x10] sm:$0xff] %vm224_vm1, %v218_v44  ;;  %v243_v55 = vmul.f32 %v218_v44, %v824_v62  ;;  %v203_v48 = vpop.permute.xlu1 %202  ;;  %v252_v50 = vsub.f32 %v236_v43, %v244_v54 }
 0x27f   :  { %v221_v51 = vmul.f32 %v203_v48, %v165_v45  ;;  %v201_v52 = vpop.permute.xlu0 %200 }
 0x280   :  { %v251_v53 = vsub.f32 %v235_v46, %v243_v55  ;;  %v220_v15 = vmul.f32 %v201_v52, %v164_v47  ;;  %260 = vst.msk [vmem:[%s1031_s10 + $0x18] sm:$0xff] %vm224_vm1, %v252_v50 }
 0x281   :  { %230 = vst.msk [vmem:[%s1030_s9 + $0x28] sm:$0xff] %vm224_vm1, %v221_v51  ;;  %v246_v62 = vmul.f32 %v221_v51, %v833_v4 }
 0x282   :  { %259 = vst.msk [vmem:[%s1031_s10 + $0x10] sm:$0xff] %vm224_vm1, %v251_v53  ;;  %229 = vst.msk [vmem:[%s1030_s9 + $0x20] sm:$0xff] %vm224_vm1, %v220_v15  ;;  %v245_v4 = vmul.f32 %v220_v15, %v841_v9  ;;  %v207_v59 = vpop.permute.xlu1 %206 }
 0x283   :  { %v254_v60 = vsub.f32 %v238_v12, %v246_v62  ;;  %v223_v61 = vmul.f32 %v207_v59, %v167_v56  ;;  %v205_v63 = vpop.permute.xlu0 %204 }
 0x284   :  { %v253_v0 = vsub.f32 %v237_v57, %v245_v4  ;;  %v222_v2 = vmul.f32 %v205_v63, %v166_v58 }
 0x285   :  { %262 = vst.msk [vmem:[%s1031_s10 + $0x28] sm:$0xff] %vm224_vm1, %v254_v60  ;;  %232 = vst.msk [vmem:[%s1030_s9 + $0x38] sm:$0xff] %vm224_vm1, %v223_v61  ;;  %v248_v9 = vmul.f32 %v223_v61, %v846_v14 }
 0x286   :  { %261 = vst.msk [vmem:[%s1031_s10 + $0x20] sm:$0xff] %vm224_vm1, %v253_v0  ;;  %231 = vst.msk [vmem:[%s1030_s9 + $0x30] sm:$0xff] %vm224_vm1, %v222_v2  ;;  %v247_v5 = vmul.f32 %v222_v2, %v851_v17 }
 0x287   :  { %v256_v6 = vsub.f32 %v240_v1, %v248_v9 }
 0x288   :  { %v255_v7 = vsub.f32 %v239_v3, %v247_v5 }
 0x289   :  { %264 = vst.msk [vmem:[%s1031_s10 + $0x38] sm:$0xff] %vm224_vm1, %v256_v6 }
 0x28a   :  { %263 = vst.msk [vmem:[%s1031_s10 + $0x30] sm:$0xff] %vm224_vm1, %v255_v7 }
 0x2c5   :  { %v570_v14 = vpop.f32.mrf.mxu1 }
 0x2c6   :  { %518 = vst.msk [vmem:[%s1032_s11 + $0x8] sm:$0xff] %vm224_vm1, %v570_v14  ;;  %523 = vrot.lane.b32.xlu1 %v570_v14, %s650_s8 }
 0x2c7   :  { %v508_v17 = vpop.f32.mrf.mxu1 }
 0x2c8   :  { %517 = vst.msk [vmem:[%s1032_s11] sm:$0xff] %vm224_vm1, %v508_v17  ;;  %521 = vrot.lane.b32.xlu0 %v508_v17, %s650_s8 }
 0x338   :  { %v524_v8 = vpop.permute.xlu1 %523 }
 0x339   :  { %551 = vst.msk [vmem:[%s1032_s11 + $0x18] sm:$0xff] %vm224_vm1, %v524_v8 }
 0x33a   :  { %v522_v10 = vpop.permute.xlu0 %521 }
 0x33b   :  { %550 = vst.msk [vmem:[%s1032_s11 + $0x10] sm:$0xff] %vm224_vm1, %v522_v10 }
 0x33c   :  { %542 = vsyncpa [#allocation3], 1 }
 0x33d   :  { %543 = vsyncpa [#allocation5], 1 }

// kernel: _lambda_.6
= control target key start
LH: loop header
LB: loop body
LE: loop exit
PB: predicated region body
PF: predicated region fallthrough
CT: control target
= control target key end

     0   :  { %s926_s24 = smov 0   ;;  %s928_s25 = smov 0   ;;  %s1041_s0 = inlined_call_operand.vmem [shape: bf16[2,64,256], index: 0, kind: input, shape index: {}]   ;;  %s1042_s1 = inlined_call_operand.vmem [shape: f32[64,1], index: 1, kind: input, shape index: {}]   ;;  %s1043_s2 = inlined_call_operand.vmem [shape: f32[64,1], index: 2, kind: input, shape index: {}]   ;;  %s1044_s3 = inlined_call_operand.vmem [shape: bf16[16,64], index: 3, kind: input, shape index: {}]   ;;  %s1045_s4 = inlined_call_operand.vmem [shape: f32[16,1], index: 4, kind: input, shape index: {}]   ;;  %s1046_s5 = inlined_call_operand.vmem [shape: f32[2,16,1], index: 5, kind: input, shape index: {}]   ;;  %s1047_s6 = inlined_call_operand.vmem [shape: bf16[2,16,256], index: 6, kind: output, shape index: {0}]   ;;  %s1048_s7 = inlined_call_operand.vmem [shape: f32[2,1,16,2], index: 7, kind: output, shape index: {1}]  }
   0x1   :  { %s930_s26 = smov 0  }
   0x2 LB: > { %s30_s27 = sadd.s32 1, %s879_s25  ;;  %p812_p0 = scmp.ge.s32.totalorder %s883_s26, 1  ;;  %s883_s26 = sphi %s930_s26, %s18_s26   ;;  %s879_s25 = sphi %s928_s25, %s1050_s25   ;;  %s875_s24 = sphi %s926_s24, %s1049_s24  }
   0x3   : > { %p32_p1 = scmp.ge.s32.totalorder %s30_s27, 2  ;;  %p273_p2 = scmp.lt.s32.totalorder %s883_s26, 3 }
   0x5   : > { %s1052_s27 = smov (%p32_p1, %s30_s27), 0  ;;  %p274_p3 = pnand %p812_p0, %p273_p2 }
   0x6   : > { %p328_p4 = scmp.lt.s32.totalorder (!%p274_p3), %s875_s24, 1 }
   0x7   : > { %277 = sbr.rel (%p274_p3) target bundleno = 525 (0x20d), region = 44 }
   0xc   : > { %v456_v0 = vld [vmem:[%s1043_s2 + $0x30] sm:$0xff]  ;;  %v885_v2 = vmov 0   ;;  %v457_v3 = vld [vmem:[%s1043_s2 + $0x38] sm:$0xff]  ;;  %v391_v5 = vld [vmem:[%s1042_s1 + $0x28] sm:$0xff]  ;;  %s1054_s24 = smov (!%p328_p4, %s875_s24), 1  ;;  %vm557_vm0 = vcmask 523264  }
   0xd   : > { %v392_v1 = vld [vmem:[%s1042_s1 + $0x30] sm:$0xff]  ;;  %859 = vset.pattern.permute.xlu1 %v885_v2  ;;  %858 = vset.pattern.permute.xlu0 %v885_v2  ;;  %v393_v4 = vld [vmem:[%s1042_s1 + $0x38] sm:$0xff]  ;;  %v390_v6 = vld [vmem:[%s1042_s1 + $0x20] sm:$0xff]  ;;  %s990_s14 = sshll.u32 %s1054_s24, 4  ;;  %s827_s30 = sshll.u32 %s1054_s24, 6  ;;  %vm650_vm1 = vcmask 7168  }
   0xe   : > { %490 = vperm.xlu1 %859, %v456_v0   ;;  %426 = vperm.xlu0 %858, %v392_v1   ;;  %v455_v7 = vld [vmem:[%s1043_s2 + $0x28] sm:$0xff]  ;;  %v454_v8 = vld [vmem:[%s1043_s2 + $0x20] sm:$0xff]  ;;  %v389_v9 = vld [vmem:[%s1042_s1 + $0x18] sm:$0xff]  ;;  %s341_s21 = scalar_lea.vmem %s1046_s5, %s990_s14  ;;  %s1011_s10 = scalar_lea.vmem %s1041_s0, %s827_s30  ;;  %vm653_vm2 = vcmask 15360  }
   0xf   : > { %593 = vmatprep.mubr.bf16.mxu0 %v885_v2  ;;  %v388_v10 = vld [vmem:[%s1042_s1 + $0x10] sm:$0xff]  ;;  %v453_v11 = vld [vmem:[%s1043_s2 + $0x18] sm:$0xff]  ;;  %v387_v13 = vld [vmem:[%s1042_s1 + $0x8] sm:$0xff]  ;;  %s350_s15 = scalar_lea.vmem %s1047_s6, %s990_s14  ;;  %s360_s18 = scalar_lea.vmem %s1048_s7, %s990_s14 }
  0x10   : > { %v452_v12 = vld [vmem:[%s1043_s2 + $0x10] sm:$0xff]  ;;  %v386_v14 = vld [vmem:[%s1042_s1] sm:$0xff]  ;;  %v451_v15 = vld [vmem:[%s1043_s2 + $0x8] sm:$0xff] }
  0x11   : > { %v450_v16 = vld [vmem:[%s1043_s2] sm:$0xff]  ;;  %v541_v17 = vld [vmem:[%s341_s21 + $0x8] sm:$0xff]  ;;  %v368_v21 = vld [vmem:[%s1011_s10 + $0x30] sm:$0xff] }
  0x12   : > { %495 = vperm.xlu1 %859, %v457_v3   ;;  %431 = vperm.xlu0 %858, %v393_v4   ;;  %v540_v18 = vld [vmem:[%s341_s21] sm:$0xff]  ;;  %v605_v19 = vld [vmem:[%s1045_s4 + $0x8] sm:$0xff]  ;;  %v382_v22 = vunpack.c.l.bf16 %v368_v21  ;;  %v383_v23 = vunpack.c.h.bf16 %v368_v21  ;;  %v369_v24 = vld [vmem:[%s1011_s10 + $0x38] sm:$0xff] }
  0x13   : > { %v604_v20 = vld [vmem:[%s1045_s4] sm:$0xff]  ;;  %v384_v27 = vunpack.c.l.bf16 %v369_v24  ;;  %v385_v28 = vunpack.c.h.bf16 %v369_v24  ;;  %v367_v31 = vld [vmem:[%s1011_s10 + $0x28] sm:$0xff]  ;;  %v365_v55 = vld [vmem:[%s1011_s10 + $0x18] sm:$0xff] }
  0x14   : > { %v366_v34 = vld [vmem:[%s1011_s10 + $0x20] sm:$0xff]  ;;  %v380_v38 = vunpack.c.l.bf16 %v367_v31  ;;  %v381_v39 = vunpack.c.h.bf16 %v367_v31  ;;  %v364_v56 = vld [vmem:[%s1011_s10 + $0x10] sm:$0xff]  ;;  %v376_v1 = vunpack.c.l.bf16 %v365_v55  ;;  %v377_v2 = vunpack.c.h.bf16 %v365_v55 }
  0x15   : > { %v378_v42 = vunpack.c.l.bf16 %v366_v34  ;;  %v379_v43 = vunpack.c.h.bf16 %v366_v34  ;;  %v374_v3 = vunpack.c.l.bf16 %v364_v56  ;;  %v375_v4 = vunpack.c.h.bf16 %v364_v56 }
  0x16   : > { %421 = vperm.xlu1 %859, %v391_v5   ;;  %416 = vperm.xlu0 %858, %v390_v6  }
  0x1a   : > { %485 = vperm.xlu1 %859, %v455_v7   ;;  %480 = vperm.xlu0 %858, %v454_v8  }
  0x1e   : > { %411 = vperm.xlu1 %859, %v389_v9   ;;  %406 = vperm.xlu0 %858, %v388_v10  }
  0x22   : > { %475 = vperm.xlu1 %859, %v453_v11   ;;  %470 = vperm.xlu0 %858, %v452_v12  }
  0x26   : > { %401 = vperm.xlu1 %859, %v387_v13   ;;  %396 = vperm.xlu0 %858, %v386_v14  }
  0x2a   : > { %465 = vperm.xlu1 %859, %v451_v15   ;;  %460 = vperm.xlu0 %858, %v450_v16  }
  0x2e   : > { %549 = vperm.xlu1 %859, %v541_v17   ;;  %544 = vperm.xlu0 %858, %v540_v18   ;;  %v363_v17 = vld [vmem:[%s1011_s10 + $0x8] sm:$0xff]  ;;  %v362_v18 = vld [vmem:[%s1011_s10] sm:$0xff] }
  0x32   : > { %613 = vperm.xlu1 %859, %v605_v19   ;;  %608 = vperm.xlu0 %858, %v604_v20  }
  0x89   : > { %v491_v25 = vpop.permute.xlu1 %490  ;;  %v427_v26 = vpop.permute.xlu0 %426 }
  0x8a   : > { %v446_v29 = vmul.f32 %v427_v26, %v382_v22  ;;  %v447_v30 = vmul.f32 %v427_v26, %v383_v23  ;;  %v373_v26 = vunpack.c.h.bf16 %v363_v17 }
  0x8c   : > { %v510_v37 = vadd.f32 %v491_v25, %v446_v29  ;;  %v511_v40 = vadd.f32 %v491_v25, %v447_v30  ;;  %v372_v25 = vunpack.c.l.bf16 %v363_v17 }
  0x8d   : > { %v496_v32 = vpop.permute.xlu1 %495  ;;  %v432_v33 = vpop.permute.xlu0 %431 }
  0x8e   : > { %v448_v35 = vmul.f32 %v432_v33, %v384_v27  ;;  %v449_v36 = vmul.f32 %v432_v33, %v385_v28  ;;  %v527_v47 = vmax.f32 %v511_v40, 0.0  ;;  %v526_v49 = vmax.f32 %v510_v37, 0.0 }
  0x8f   : > { %v370_v27 = vunpack.c.l.bf16 %v362_v18  ;;  %v371_v28 = vunpack.c.h.bf16 %v362_v18 }
  0x90   : > { %v512_v41 = vadd.f32 %v496_v32, %v448_v35  ;;  %v513_v44 = vadd.f32 %v496_v32, %v449_v36 }
  0x91   : > { %v422_v45 = vpop.permute.xlu1 %421  ;;  %v417_v46 = vpop.permute.xlu0 %416 }
  0x92   : > { %v529_v48 = vmax.f32 %v513_v44, 0.0  ;;  %v528_v50 = vmax.f32 %v512_v41, 0.0  ;;  %v444_v51 = vmul.f32 %v422_v45, %v380_v38  ;;  %v445_v52 = vmul.f32 %v422_v45, %v381_v39 }
  0x93   : > { %v442_v53 = vmul.f32 %v417_v46, %v378_v42  ;;  %v443_v54 = vmul.f32 %v417_v46, %v379_v43 }
  0x94   : > { %v539_v59 = vpack.c.bf16 %v529_v48, %v527_v47  ;;  %v538_v60 = vpack.c.bf16 %v528_v50, %v526_v49 }
  0x95   : > { %v486_v57 = vpop.permute.xlu1 %485  ;;  %v481_v58 = vpop.permute.xlu0 %480 }
  0x96   : > { %v508_v61 = vadd.f32 %v486_v57, %v444_v51  ;;  %v509_v62 = vadd.f32 %v486_v57, %v445_v52  ;;  %v506_v63 = vadd.f32 %v481_v58, %v442_v53  ;;  %v507_v0 = vadd.f32 %v481_v58, %v443_v54  ;;  %569 = vmatprep.subr.bf16.mxu0 %v539_v59  ;;  %v860_v53 = vld [vmem:[%s1044_s3] sm:$0xff]  }
  0x97   : > { %570 = vmatpush1.bf16.msra.mxu0 %v538_v60 }
  0x98   : > { %v524_v5 = vmax.f32 %v508_v61, 0.0  ;;  %v525_v6 = vmax.f32 %v509_v62, 0.0  ;;  %v522_v7 = vmax.f32 %v506_v63, 0.0  ;;  %v523_v8 = vmax.f32 %v507_v0, 0.0 }
  0x99   : > { %v412_v9 = vpop.permute.xlu1 %411  ;;  %v407_v10 = vpop.permute.xlu0 %406 }
  0x9a   : > { %v537_v11 = vpack.c.bf16 %v525_v6, %v523_v8  ;;  %v536_v12 = vpack.c.bf16 %v524_v5, %v522_v7  ;;  %v440_v13 = vmul.f32 %v412_v9, %v376_v1  ;;  %v441_v14 = vmul.f32 %v412_v9, %v377_v2 }
  0x9b   : > { %v438_v15 = vmul.f32 %v407_v10, %v374_v3  ;;  %v439_v16 = vmul.f32 %v407_v10, %v375_v4 }
  0x9c   : > { %571 = vmatprep.subr.bf16.mxu0 %v537_v11 }
  0x9d   : > { %v476_v19 = vpop.permute.xlu1 %475  ;;  %v471_v20 = vpop.permute.xlu0 %470  ;;  %572 = vmatpush1.bf16.msra.mxu0 %v536_v12 }
  0x9e   : > { %v504_v21 = vadd.f32 %v476_v19, %v440_v13  ;;  %v505_v22 = vadd.f32 %v476_v19, %v441_v14  ;;  %v502_v23 = vadd.f32 %v471_v20, %v438_v15  ;;  %v503_v24 = vadd.f32 %v471_v20, %v439_v16 }
  0xa0   : > { %v520_v29 = vmax.f32 %v504_v21, 0.0  ;;  %v521_v30 = vmax.f32 %v505_v22, 0.0  ;;  %v518_v31 = vmax.f32 %v502_v23, 0.0  ;;  %v519_v32 = vmax.f32 %v503_v24, 0.0 }
  0xa1   : > { %v402_v33 = vpop.permute.xlu1 %401  ;;  %v397_v34 = vpop.permute.xlu0 %396 }
  0xa2   : > { %v535_v35 = vpack.c.bf16 %v521_v30, %v519_v32  ;;  %v534_v36 = vpack.c.bf16 %v520_v29, %v518_v31  ;;  %v436_v37 = vmul.f32 %v402_v33, %v372_v25  ;;  %v437_v38 = vmul.f32 %v402_v33, %v373_v26 }
  0xa3   : > { %v434_v39 = vmul.f32 %v397_v34, %v370_v27  ;;  %v435_v40 = vmul.f32 %v397_v34, %v371_v28 }
  0xa4   : > { %573 = vmatprep.subr.bf16.mxu0 %v535_v35 }
  0xa5   : > { %v466_v41 = vpop.permute.xlu1 %465  ;;  %v461_v42 = vpop.permute.xlu0 %460  ;;  %574 = vmatpush1.bf16.msra.mxu0 %v534_v36 }
  0xa6   : > { %v500_v43 = vadd.f32 %v466_v41, %v436_v37  ;;  %v501_v44 = vadd.f32 %v466_v41, %v437_v38  ;;  %v498_v45 = vadd.f32 %v461_v42, %v434_v39  ;;  %v499_v46 = vadd.f32 %v461_v42, %v435_v40 }
  0xa8   : > { %v516_v47 = vmax.f32 %v500_v43, 0.0  ;;  %v517_v48 = vmax.f32 %v501_v44, 0.0  ;;  %v514_v49 = vmax.f32 %v498_v45, 0.0  ;;  %v515_v50 = vmax.f32 %v499_v46, 0.0 }
  0xa9   : > { %v545_v54 = vpop.permute.xlu0 %544  ;;  %v550_v57 = vpop.permute.xlu1 %549 }
  0xaa   : > { %v533_v51 = vpack.c.bf16 %v517_v48, %v515_v50  ;;  %v532_v52 = vpack.c.bf16 %v516_v47, %v514_v49 }
  0xac   : > { %575 = vmatprep.subr.bf16.mxu0 %v533_v51 }
  0xad   : > { %576 = vmatpush1.bf16.msra.mxu0 %v532_v52  ;;  %v609_v60 = vpop.permute.xlu0 %608  ;;  %v614_v5 = vpop.permute.xlu1 %613 }
  0xb0   : > { %822 = vmatmul.mubr.msk.bf16.vlgmr.msra.gmra.mxu0 %vm557_vm0, %v860_v53 }
 0x170   : > { %v595_v55 = vpop.f32.mrf.mxu0 }
 0x171   : > { %v596_v56 = vadd.f32 %v595_v55, %v545_v54 }
 0x172   : > { %v597_v58 = vpop.f32.mrf.mxu0 }
 0x173   : > { %v598_v59 = vadd.f32 %v597_v58, %v545_v54  ;;  %v616_v62 = vadd.f32 %v609_v60, %v596_v56 }
 0x174   : > { %v599_v61 = vpop.f32.mrf.mxu0 }
 0x175   : > { %v617_v63 = vadd.f32 %v609_v60, %v598_v59  ;;  %v600_v0 = vadd.f32 %v599_v61, %v550_v57  ;;  %v640_v9 = vmul.f32 %v616_v62, %v616_v62 }
 0x176   : > { %v601_v1 = vpop.f32.mrf.mxu0 }
 0x177   : > { %v831_v2 = vpack.c.bf16 %v617_v63, %v616_v62  ;;  %v602_v3 = vadd.f32 %v601_v1, %v550_v57  ;;  %v634_v4 = vadd.f32 %v617_v63, %v616_v62  ;;  %v641_v6 = vmul.f32 %v617_v63, %v617_v63 }
 0x178   : > { %v618_v7 = vadd.f32 %v614_v5, %v600_v0 }
 0x179   : > { %632 = vst [vmem:[%s350_s15] sm:$0xff] %v831_v2  ;;  %v619_v8 = vadd.f32 %v614_v5, %v602_v3  ;;  %635 = vadd.xlane.f32.xlu0 %v634_v4  ;;  %v644_v12 = vadd.f32 %v641_v6, %v640_v9 }
 0x17a   : > { %v642_v14 = vmul.f32 %v618_v7, %v618_v7 }
 0x17b   : > { %v832_v10 = vpack.c.bf16 %v619_v8, %v618_v7  ;;  %v637_v11 = vadd.f32 %v619_v8, %v618_v7  ;;  %v643_v13 = vmul.f32 %v619_v8, %v619_v8 }
 0x17d   : > { %633 = vst [vmem:[%s350_s15 + $0x8] sm:$0xff] %v832_v10  ;;  %638 = vadd.xlane.f32.xlu1 %v637_v11  ;;  %645 = vadd.xlane.f32.xlu0 %v644_v12  ;;  %v647_v15 = vadd.f32 %v643_v13, %v642_v14 }
 0x181   : > { %648 = vadd.xlane.f32.xlu0 %v647_v15 }
 0x202   : > { %v636_v16 = vpop.xlane.xlu0 %635 }
 0x206   : > { %v646_v17 = vpop.xlane.xlu0 %645  ;;  %v639_v19 = vpop.xlane.xlu1 %638 }
 0x207   : > { %v651_v18 = vsel %vm650_vm1, %v636_v16, %v646_v17 }
 0x208   : > { %654 = vst.msk [vmem:[%s360_s18] sm:$0xff] %vm653_vm2, %v651_v18 }
 0x20a   : > { %v649_v20 = vpop.xlane.xlu0 %648 }
 0x20b   : > { %v652_v21 = vsel %vm650_vm1, %v639_v19, %v649_v20 }
 0x20c   : > { %655 = vst.msk [vmem:[%s360_s18 + $0x8] sm:$0xff] %vm653_vm2, %v652_v21 }
 0x20d PF: > { %s18_s26 = sadd.s32 1, %s883_s26   ;;  %s1049_s24 = smov %s879_s25 }
 0x20e   : > { %p15_p5 = scmp.ge.s32.totalorder %s18_s26, 4   ;;  %s1050_s25 = smov %s1052_s27 }
 0x210   :  { %17 = sbr.rel (!%p15_p5) target bundleno = 2 (0x2), region = 89 }

// kernel: _lambda_.4
= control target key start
LH: loop header
LB: loop body
LE: loop exit
PB: predicated region body
PF: predicated region fallthrough
CT: control target
= control target key end

     0   :  { %s1337_s21 = smov 0   ;;  %s1656_s0 = inlined_call_operand.vmem [shape: f32[2,4,256], index: 0, kind: input, shape index: {}]   ;;  %s1657_s1 = inlined_call_operand.vmem [shape: f32[28,256], index: 1, kind: input, shape index: {}]   ;;  %s1658_s2 = inlined_call_operand.vmem [shape: bf16[64,112], index: 2, kind: input, shape index: {}]   ;;  %s1659_s3 = inlined_call_operand.vmem [shape: f32[64,1], index: 3, kind: input, shape index: {}]   ;;  %s1660_s4 = inlined_call_operand.vmem [shape: bf16[2,64,256], index: 4, kind: output, shape index: {0}]   ;;  %s1661_s5 = inlined_call_operand.vmem [shape: f32[2,64,2], index: 5, kind: output, shape index: {1}]   ;;  %s1662_s6 = inlined_call_operand.vmem [shape: f32[2,4,1], index: 6, kind: output, shape index: {2}]  }
   0x1 LB: > { %s1163_s22 = sadd.s32 4294967295, %s1284_s21   ;;  %p1167_p0 = scmp.ge.s32.totalorder %s1284_s21, 1  ;;  %s1284_s21 = sphi %s1337_s21, %s17_s21  }
   0x2   : > { %p217_p1 = scmp.lt.s32.totalorder %s1284_s21, 3 }
   0x4   : > { %p218_p2 = pnand %p1167_p0, %p217_p1 }
   0x5   : > { %p256_p3 = scmp.lt.s32.totalorder (!%p218_p2), %s1163_s22, 1  ;;  %s1286_s27 = smov (!%p218_p2), 76  }
   0x6   : > { %221 = sbr.rel (%p218_p2) target bundleno = 559 (0x22f), region = 36  ;;  %s1287_s28 = smov (!%p218_p2), 64  }
   0x7   : > { %s1290_s29 = smov (!%p218_p2), 52   ;;  %s1291_s30 = smov (!%p218_p2), 12  }
   0x8   : > { %s1292_s7 = smov (!%p218_p2), 116   ;;  %s1293_s8 = smov (!%p218_p2), 26  }
   0x9   : > { %s1294_s9 = smov (!%p218_p2), 32   ;;  %s1295_s10 = smov (!%p218_p2), 38  }
   0xa   : > { %s1296_s11 = smov (!%p218_p2), 6   ;;  %s1297_s12 = smov (!%p218_p2), 122  }
   0xb   : > { %s1666_s22 = smov (!%p256_p3, %s1163_s22), 1  ;;  %vm694_vm0 = vcmask 1043456   ;;  %vm1288_vm2 = vmmov 1   ;;  %v1289_v3 = vmov 0.0   ;;  %s1298_s13 = smov 102   ;;  %v1299_v6 = vmov 0  }
   0xc   : > { %s1223_s23 = sshll.u32 %s1666_s22, 3  ;;  %vm1195_vm1 = vmneg %vm694_vm0  ;;  %857 = vmatprep.mubr.bf16.mxu0 %v1299_v6  ;;  %877 = vmatprep.mubr.bf16.mxu1 %v1299_v6  ;;  %s1300_s14 = smov 90   ;;  %v745_v7 = vld [vmem:[%s1659_s3 + $0x8] sm:$0xff]  ;;  %v744_v8 = vld [vmem:[%s1659_s3] sm:$0xff]  ;;  %v292_v15 = vlaneseq  ;;  %vm483_vm4 = vcmask 621568   ;;  %vm533_vm5 = vcmask 424960  }
   0xd   : > { %s260_s26 = scalar_lea.vmem %s1656_s0, %s1223_s23  ;;  %vm1196_vm3 = vmpackc.low %vm1195_vm1, %vm1288_vm2  ;;  %1271 = vset.pattern.permute.xlu1 %v1299_v6  ;;  %1270 = vset.pattern.permute.xlu0 %v1299_v6  ;;  %s1301_s15 = smov 96   ;;  %v746_v9 = vld [vmem:[%s1659_s3 + $0x10] sm:$0xff]  ;;  %v747_v10 = vld [vmem:[%s1659_s3 + $0x18] sm:$0xff]  ;;  %vm508_vm6 = vcmask 523264   ;;  %vm559_vm7 = vcmask 97280   ;;  %vm583_vm8 = vcmask 949248  }
   0xe   : > { %v1351_v0 = vld [vmem:[%s260_s26] sm:$0xff]  ;;  %v749_v12 = vld [vmem:[%s1659_s3 + $0x28] sm:$0xff]  ;;  %v750_v13 = vld [vmem:[%s1659_s3 + $0x30] sm:$0xff]  ;;  %v293_v16 = vshrl.u32 %v292_v15, 7  ;;  %vm458_vm10 = vcmask 211968   ;;  %vm433_vm11 = vcmask 261120  }
   0xf   : > { %479 = vrot.lane.b32.xlu1 %v1351_v0, %s1286_s27  ;;  %504 = vrot.lane.b32.xlu0 %v1351_v0, %s1287_s28  ;;  %v1358_v1 = vcombine.high %v1351_v0, %v1351_v0  ;;  %v1363_v2 = vcombine.low %v1351_v0, %v1351_v0  ;;  %v1197_v4 = vpack.c.bf16 %v1351_v0, %v1289_v3  ;;  %v748_v11 = vld [vmem:[%s1659_s3 + $0x20] sm:$0xff]  ;;  %v751_v14 = vld [vmem:[%s1659_s3 + $0x38] sm:$0xff]  ;;  %vm1496_vm9 = vmpackc.low %vm694_vm0, %vm1288_vm2  ;;  %vm408_vm12 = vcmask 310272  }
  0x10   : > { %v1419_v19 = vsub.s32 0, %v293_v16  ;;  %v1421_v20 = vsub.s32 1, %v293_v16  ;;  %v1426_v21 = vld [vmem:[%s1657_s1 + $0x12] ss:$8 sm:$0x3]  ;;  %vm359_vm13 = vcmask 48128  }
  0x11   : > { %1198 = vmatprep.subr.msk.bf16.mxu0 %vm1196_vm3, %v1197_v4  ;;  %v1201_v5 = vpack.c.bf16 %v1363_v2, %v1289_v3  ;;  %1234 = vmatprep.subr.msk.bf16.mxu1 %vm1196_vm3, %v1197_v4  ;;  %v1188_v23 = vld [vmem:[%s1657_s1 + $0x20] ss:$8 sm:$0x3]  ;;  %v1189_v25 = vld [vmem:[%s1657_s1 + $0x21] ss:$8 sm:$0x3] }
  0x12   : > { %v1437_v26 = vld [vmem:[%s1657_s1 + $0x14] ss:$8 sm:$0x3]  ;;  %v1190_v27 = vld [vmem:[%s1657_s1 + $0x22] ss:$8 sm:$0x3]  ;;  %v495_v28 = vrot.slane %v1426_v21, %v1419_v19  ;;  %v499_v29 = vrot.slane %v1426_v21, %v1421_v20  ;;  %v610_v31 = vrot.slane %v1188_v23, %v1419_v19  ;;  %v614_v32 = vrot.slane %v1188_v23, %v1421_v20 }
  0x13   : > { %529 = vrot.lane.b32.xlu0 %v1351_v0, %s1290_s29  ;;  %481 = vrot.lane.b32.xlu1 %v1358_v1, %s1286_s27  ;;  %v1449_v30 = vld [vmem:[%s1657_s1 + $0x13] ss:$8 sm:$0x3]  ;;  %v625_v33 = vrot.slane %v1189_v25, %v1419_v19  ;;  %v629_v34 = vrot.slane %v1189_v25, %v1421_v20  ;;  %v1186_v35 = vld [vmem:[%s1657_s1 + $0x15] ss:$8 sm:$0x3]  ;;  %v545_v36 = vrot.slane %v1437_v26, %v1419_v19 }
  0x14   : > { %1202 = vmatpush1.bf16.msk.msra.mxu0 %vm1196_vm3, %v1201_v5  ;;  %1240 = vmatpush1.bf16.msk.msra.mxu1 %vm1196_vm3, %v1201_v5  ;;  %v549_v37 = vrot.slane %v1437_v26, %v1421_v20  ;;  %v640_v38 = vrot.slane %v1190_v27, %v1419_v19  ;;  %v644_v41 = vrot.slane %v1190_v27, %v1421_v20  ;;  %v1187_v45 = vld [vmem:[%s1657_s1 + $0x17] ss:$8 sm:$0x3]  ;;  %v1182_v63 = vld [vmem:[%s1657_s1 + $0x11] ss:$8 sm:$0x3] }
  0x15   : > { %v520_v42 = vrot.slane %v1449_v30, %v1419_v19  ;;  %v570_v48 = vrot.slane %v1186_v35, %v1419_v19  ;;  %v574_v49 = vrot.slane %v1186_v35, %v1421_v20  ;;  %v524_v54 = vrot.slane %v1449_v30, %v1421_v20 }
  0x16   : > { %v595_v57 = vrot.slane %v1187_v45, %v1419_v19  ;;  %v599_v58 = vrot.slane %v1187_v45, %v1421_v20  ;;  %vm383_vm14 = vcmask 998400   ;;  %vm284_vm15 = vcmask 834560  }
  0x17   : > { %531 = vrot.lane.b32.xlu1 %v1358_v1, %s1290_s29  ;;  %506 = vrot.lane.b32.xlu0 %v1358_v1, %s1287_s28  ;;  %vm334_vm1 = vcmask 736256   ;;  %vm309_vm2 = vcmask 785408   ;;  %vm812_vm3 = vcmask 916480  }
  0x1b   : > { %557 = vrot.lane.b32.xlu1 %v1351_v0, %s1291_s30  ;;  %554 = vrot.lane.b32.xlu0 %v1358_v1, %s1291_s30  ;;  %s1224_s30 = sshll.u32 %s1666_s22, 6 }
  0x1c   : > { %s1627_s16 = scalar_lea.vmem %s1661_s5, %s1224_s30 }
  0x1f   : > { %581 = vrot.lane.b32.xlu1 %v1358_v1, %s1292_s7  ;;  %579 = vrot.lane.b32.xlu0 %v1351_v0, %s1292_s7 }
  0x23   : > { %456 = vrot.lane.b32.xlu1 %v1358_v1, %s1293_s8  ;;  %454 = vrot.lane.b32.xlu0 %v1351_v0, %s1293_s8 }
  0x27   : > { %431 = vrot.lane.b32.xlu1 %v1358_v1, %s1294_s9  ;;  %429 = vrot.lane.b32.xlu0 %v1351_v0, %s1294_s9  ;;  %s1605_s9 = scalar_lea.vmem %s1660_s4, %s1224_s30 }
  0x2b   : > { %406 = vrot.lane.b32.xlu1 %v1358_v1, %s1295_s10  ;;  %404 = vrot.lane.b32.xlu0 %v1351_v0, %s1295_s10  ;;  %s1174_s10 = sshll.u32 %s1666_s22, 2 }
  0x2f   : > { %357 = vrot.lane.b32.xlu1 %v1351_v0, %s1296_s11  ;;  %354 = vrot.lane.b32.xlu0 %v1358_v1, %s1296_s11 }
  0x33   : > { %381 = vrot.lane.b32.xlu1 %v1358_v1, %s1297_s12  ;;  %379 = vrot.lane.b32.xlu0 %v1351_v0, %s1297_s12 }
  0x37   : > { %282 = vrot.lane.b32.xlu1 %v1351_v0, %s1298_s13  ;;  %279 = vrot.lane.b32.xlu0 %v1358_v1, %s1298_s13  ;;  %s274_s13 = scalar_lea.vmem %s1662_s6, %s1174_s10 }
  0x3b   : > { %332 = vrot.lane.b32.xlu1 %v1351_v0, %s1300_s14  ;;  %329 = vrot.lane.b32.xlu0 %v1358_v1, %s1300_s14 }
  0x3f   : > { %307 = vrot.lane.b32.xlu1 %v1351_v0, %s1301_s15  ;;  %304 = vrot.lane.b32.xlu0 %v1358_v1, %s1301_s15 }
  0x43   : > { %759 = vperm.xlu1 %1271, %v745_v7   ;;  %754 = vperm.xlu0 %1270, %v744_v8  }
  0x47   : > { %764 = vperm.xlu1 %1271, %v746_v9   ;;  %769 = vperm.xlu0 %1270, %v747_v10  }
  0x4b   : > { %774 = vperm.xlu1 %1271, %v748_v11   ;;  %779 = vperm.xlu0 %1270, %v749_v12  }
  0x4f   : > { %784 = vperm.xlu1 %1271, %v750_v13   ;;  %789 = vperm.xlu0 %1270, %v751_v14   ;;  %v1181_v13 = vld [vmem:[%s1657_s1 + $0x10] ss:$8 sm:$0x3] }
  0x81   : > { %v480_v17 = vpop.permute.xlu1 %479  ;;  %v505_v18 = vpop.permute.xlu0 %504 }
  0x85   : > { %v530_v22 = vpop.permute.xlu0 %529  ;;  %v482_v24 = vpop.permute.xlu1 %481 }
  0x86   : > { %v1472_v46 = vsel %vm483_vm4, %v480_v17, %v482_v24  ;;  %v1475_v47 = vsel %vm483_vm4, %v482_v24, %v480_v17  ;;  %vm1018_vm4 = vcmask 7168  }
  0x87   : > { %v617_v59 = vmul.f32 %v610_v31, %v1475_v47  ;;  %v618_v60 = vmul.f32 %v614_v32, %v1472_v46  ;;  %v445_v31 = vrot.slane %v1181_v13, %v1419_v19 }
  0x89   : > { %v532_v39 = vpop.permute.xlu1 %531  ;;  %v507_v40 = vpop.permute.xlu0 %506 }
  0x8a   : > { %v509_v43 = vsel %vm508_vm6, %v505_v18, %v507_v40  ;;  %v513_v44 = vsel %vm508_vm6, %v507_v40, %v505_v18  ;;  %v534_v50 = vsel %vm533_vm5, %v530_v22, %v532_v39  ;;  %v538_v51 = vsel %vm533_vm5, %v532_v39, %v530_v22 }
  0x8b   : > { %v632_v52 = vmul.f32 %v625_v33, %v513_v44  ;;  %v633_v53 = vmul.f32 %v629_v34, %v509_v43  ;;  %v647_v3 = vmul.f32 %v640_v38, %v538_v51  ;;  %v648_v4 = vmul.f32 %v644_v41, %v534_v50 }
  0x8c   : > { %v470_v18 = vrot.slane %v1182_v63, %v1419_v19  ;;  %v474_v22 = vrot.slane %v1182_v63, %v1421_v20  ;;  %v552_v32 = vmul.f32 %v545_v36, %v534_v50  ;;  %v553_v33 = vmul.f32 %v549_v37, %v538_v51 }
  0x8d   : > { %v558_v55 = vpop.permute.xlu1 %557  ;;  %v555_v56 = vpop.permute.xlu0 %554  ;;  %v713_v61 = vrot.slane %v632_v52, 4  ;;  %v714_v62 = vrot.slane %v633_v53, 4  ;;  %v449_v34 = vrot.slane %v1181_v13, %v1421_v20  ;;  %v527_v35 = vmul.f32 %v520_v42, %v509_v43 }
  0x8e   : > { %v560_v5 = vsel %vm559_vm7, %v558_v55, %v555_v56  ;;  %v563_v7 = vsel %vm559_vm7, %v555_v56, %v558_v55  ;;  %v528_v38 = vmul.f32 %v524_v54, %v513_v44  ;;  %v502_v44 = vmul.f32 %v495_v28, %v1472_v46  ;;  %v1180_v28 = vld [vmem:[%s1657_s1 + $0x7] ss:$8 sm:$0x3] }
  0x8f   : > { %v717_v8 = vsel %vm694_vm0, %v617_v59, %v713_v61  ;;  %v718_v9 = vsel %vm694_vm0, %v618_v60, %v714_v62  ;;  %v577_v10 = vmul.f32 %v570_v48, %v563_v7  ;;  %v578_v11 = vmul.f32 %v574_v49, %v560_v5 }
  0x90   : > { %v1204_v16 = vpack.c.bf16 %v648_v4, %v718_v9  ;;  %v1207_v17 = vpack.c.bf16 %v647_v3, %v717_v8  ;;  %v678_v54 = vrot.slane %v527_v35, 4  ;;  %v679_v55 = vrot.slane %v528_v38, 4  ;;  %v1178_v9 = vld [vmem:[%s1657_s1 + $0x4] ss:$8 sm:$0x3] }
  0x91   : > { %v582_v14 = vpop.permute.xlu1 %581  ;;  %v580_v15 = vpop.permute.xlu0 %579  ;;  %v684_v23 = vrot.slane %v577_v10, 4  ;;  %v685_v24 = vrot.slane %v578_v11, 4  ;;  %v420_v10 = vrot.slane %v1180_v28, %v1419_v19  ;;  %v424_v11 = vrot.slane %v1180_v28, %v1421_v20 }
  0x92   : > { %v584_v25 = vsel %vm583_vm8, %v580_v15, %v582_v14  ;;  %v588_v26 = vsel %vm583_vm8, %v582_v14, %v580_v15  ;;  %1205 = vmatprep.subr.msk.bf16.mxu0 %vm1496_vm9, %v1204_v16  ;;  %1235 = vmatprep.subr.msk.bf16.mxu1 %vm1496_vm9, %v1204_v16  ;;  %v705_v5 = vsel %vm694_vm0, %v502_v44, %v678_v54  ;;  %v1179_v14 = vld [vmem:[%s1657_s1 + $0x6] ss:$8 sm:$0x3]  ;;  %vm1027_vm5 = vcmask 15360  }
  0x93   : > { %v602_v27 = vmul.f32 %v595_v57, %v584_v25  ;;  %v603_v30 = vmul.f32 %v599_v58, %v588_v26  ;;  %1208 = vmatpush1.bf16.msk.msra.mxu0 %vm1496_vm9, %v1207_v17  ;;  %1241 = vmatpush1.bf16.msk.msra.mxu1 %vm1496_vm9, %v1207_v17  ;;  %v708_v36 = vsel %vm694_vm0, %v553_v33, %v685_v24 }
  0x94   : > { %v707_v37 = vsel %vm694_vm0, %v552_v32, %v684_v23  ;;  %v503_v58 = vmul.f32 %v499_v29, %v1475_v47  ;;  %v370_v16 = vrot.slane %v1178_v9, %v1419_v19  ;;  %v374_v17 = vrot.slane %v1178_v9, %v1421_v20 }
  0x95   : > { %v690_v39 = vrot.slane %v602_v27, 4  ;;  %v691_v40 = vrot.slane %v603_v30, 4  ;;  %v457_v41 = vpop.permute.xlu1 %456  ;;  %v455_v45 = vpop.permute.xlu0 %454  ;;  %v395_v26 = vrot.slane %v1179_v14, %v1419_v19  ;;  %v399_v27 = vrot.slane %v1179_v14, %v1421_v20 }
  0x96   : > { %v459_v48 = vsel %vm458_vm10, %v455_v45, %v457_v41  ;;  %v463_v49 = vsel %vm458_vm10, %v457_v41, %v455_v45  ;;  %v706_v47 = vsel %vm694_vm0, %v503_v58, %v679_v55  ;;  %v1176_v58 = vld [vmem:[%s1657_s1 + $0x2] ss:$8 sm:$0x3] }
  0x97   : > { %v477_v50 = vmul.f32 %v470_v18, %v459_v48  ;;  %v478_v51 = vmul.f32 %v474_v22, %v463_v49  ;;  %v710_v52 = vsel %vm694_vm0, %v1358_v1, %v691_v40  ;;  %v709_v53 = vsel %vm694_vm0, %v1351_v0, %v690_v39 }
  0x98   : > { %v738_v42 = vpack.c.bf16 %v710_v52, %v708_v36  ;;  %v737_v43 = vpack.c.bf16 %v709_v53, %v707_v37  ;;  %v1177_v36 = vld [vmem:[%s1657_s1 + $0x3] ss:$8 sm:$0x3] }
  0x99   : > { %v432_v56 = vpop.permute.xlu1 %431  ;;  %v430_v57 = vpop.permute.xlu0 %429  ;;  %v672_v61 = vrot.slane %v477_v50, 4  ;;  %v673_v62 = vrot.slane %v478_v51, 4 }
  0x9a   : > { %v434_v59 = vsel %vm433_vm11, %v430_v57, %v432_v56  ;;  %v438_v60 = vsel %vm433_vm11, %v432_v56, %v430_v57  ;;  %833 = vmatprep.subr.bf16.mxu0 %v738_v42  ;;  %1236 = vmatprep.subr.bf16.mxu1 %v738_v42  ;;  %v345_v56 = vrot.slane %v1177_v36, %v1419_v19 }
  0x9b   : > { %v452_v63 = vmul.f32 %v445_v31, %v434_v59  ;;  %v453_v3 = vmul.f32 %v449_v34, %v438_v60  ;;  %834 = vmatpush1.bf16.msra.mxu0 %v737_v43  ;;  %1242 = vmatpush1.bf16.msra.mxu1 %v737_v43  ;;  %v1175_v34 = vld [vmem:[%s1657_s1 + $0x1] ss:$8 sm:$0x3]  ;;  %v349_v57 = vrot.slane %v1177_v36, %v1421_v20 }
  0x9c   : > { %v295_v48 = vrot.slane %v1175_v34, %v1419_v19  ;;  %v299_v49 = vrot.slane %v1175_v34, %v1421_v20 }
  0x9d   : > { %v407_v46 = vpop.permute.xlu1 %406  ;;  %v405_v21 = vpop.permute.xlu0 %404  ;;  %v704_v29 = vsel %vm694_vm0, %v453_v3, %v673_v62  ;;  %v703_v4 = vsel %vm694_vm0, %v452_v63, %v672_v61 }
  0x9e   : > { %v736_v7 = vpack.c.bf16 %v706_v47, %v704_v29  ;;  %v735_v8 = vpack.c.bf16 %v705_v5, %v703_v4  ;;  %v409_v12 = vsel %vm408_vm12, %v405_v21, %v407_v46  ;;  %v413_v13 = vsel %vm408_vm12, %v407_v46, %v405_v21 }
  0x9f   : > { %v427_v24 = vmul.f32 %v420_v10, %v409_v12  ;;  %v428_v25 = vmul.f32 %v424_v11, %v413_v13  ;;  %v320_v46 = vrot.slane %v1176_v58, %v1419_v19  ;;  %v324_v21 = vrot.slane %v1176_v58, %v1421_v20 }
  0xa0   : > { %835 = vmatprep.subr.bf16.mxu0 %v736_v7  ;;  %1237 = vmatprep.subr.bf16.mxu1 %v736_v7 }
  0xa1   : > { %v358_v15 = vpop.permute.xlu1 %357  ;;  %836 = vmatpush1.bf16.msra.mxu0 %v735_v8  ;;  %1243 = vmatpush1.bf16.msra.mxu1 %v735_v8  ;;  %v355_v18 = vpop.permute.xlu0 %354  ;;  %v666_v39 = vrot.slane %v427_v24, 4  ;;  %v667_v40 = vrot.slane %v428_v25, 4  ;;  %v1036_v24 = vsel %vm694_vm0, %v1351_v0, 0.0  ;;  %v1037_v25 = vsel %vm694_vm0, %v1358_v1, 0.0 }
  0xa2   : > { %v360_v22 = vsel %vm359_vm13, %v358_v15, %v355_v18  ;;  %v363_v23 = vsel %vm359_vm13, %v355_v18, %v358_v15  ;;  %v1275_v18 = vld [vmem:[%s1658_s2 + $0x10] sm:$0xff]  }
  0xa3   : > { %v377_v30 = vmul.f32 %v370_v16, %v363_v23  ;;  %v378_v31 = vmul.f32 %v374_v17, %v360_v22  ;;  %v1274_v17 = vld [vmem:[%s1658_s2] sm:$0xff]   ;;  %v1276_v22 = vld [vmem:[%s1658_s2 + $0x8] sm:$0xff]   ;;  %v1277_v23 = vld [vmem:[%s1658_s2 + $0x18] sm:$0xff]  }
  0xa5   : > { %v382_v32 = vpop.permute.xlu1 %381  ;;  %v380_v33 = vpop.permute.xlu0 %379  ;;  %v700_v51 = vsel %vm694_vm0, %v378_v31, %v1351_v0  ;;  %v699_v53 = vsel %vm694_vm0, %v377_v30, %v1363_v2 }
  0xa6   : > { %v384_v35 = vsel %vm383_vm14, %v380_v33, %v382_v32  ;;  %v388_v38 = vsel %vm383_vm14, %v382_v32, %v380_v33 }
  0xa7   : > { %v402_v41 = vmul.f32 %v395_v26, %v384_v35  ;;  %v403_v45 = vmul.f32 %v399_v27, %v388_v38  ;;  %v1038_v26 = vadd.f32 %v1037_v25, %v1036_v24 }
  0xa9   : > { %v283_v37 = vpop.permute.xlu1 %282  ;;  %v280_v50 = vpop.permute.xlu0 %279  ;;  %v702_v52 = vsel %vm694_vm0, %v403_v45, %v667_v40  ;;  %v701_v42 = vsel %vm694_vm0, %v402_v41, %v666_v39  ;;  %1039 = vadd.xlane.f32.xlu1 %v1038_v26 }
  0xaa   : > { %v285_v43 = vsel %vm284_vm15, %v283_v37, %v280_v50  ;;  %v288_v44 = vsel %vm284_vm15, %v280_v50, %v283_v37  ;;  %v734_v54 = vpack.c.bf16 %v702_v52, %v700_v51  ;;  %v733_v55 = vpack.c.bf16 %v701_v42, %v699_v53 }
  0xab   : > { %v302_v59 = vmul.f32 %v295_v48, %v288_v44  ;;  %v303_v60 = vmul.f32 %v299_v49, %v285_v43 }
  0xac   : > { %837 = vmatprep.subr.bf16.mxu0 %v734_v54  ;;  %1238 = vmatprep.subr.bf16.mxu1 %v734_v54 }
  0xad   : > { %v333_v2 = vpop.permute.xlu1 %332  ;;  %838 = vmatpush1.bf16.msra.mxu0 %v733_v55  ;;  %1244 = vmatpush1.bf16.msra.mxu1 %v733_v55  ;;  %v330_v61 = vpop.permute.xlu0 %329  ;;  %v652_v29 = vrot.slane %v302_v59, 4  ;;  %v653_v47 = vrot.slane %v303_v60, 4 }
  0xae   : > { %v335_v62 = vsel %vm334_vm1, %v333_v2, %v330_v61  ;;  %v338_v63 = vsel %vm334_vm1, %v330_v61, %v333_v2 }
  0xaf   : > { %v352_v3 = vmul.f32 %v345_v56, %v338_v63  ;;  %v353_v28 = vmul.f32 %v349_v57, %v335_v62  ;;  %v696_v13 = vsel %vm694_vm0, %v1358_v1, %v653_v47  ;;  %v695_v19 = vsel %vm694_vm0, %v1351_v0, %v652_v29 }
  0xb1   : > { %v308_v4 = vpop.permute.xlu1 %307  ;;  %v305_v5 = vpop.permute.xlu0 %304  ;;  %v658_v9 = vrot.slane %v352_v3, 4  ;;  %v659_v10 = vrot.slane %v353_v28, 4 }
  0xb2   : > { %v310_v7 = vsel %vm309_vm2, %v308_v4, %v305_v5  ;;  %v313_v8 = vsel %vm309_vm2, %v305_v5, %v308_v4 }
  0xb3   : > { %v327_v11 = vmul.f32 %v320_v46, %v313_v8  ;;  %v328_v12 = vmul.f32 %v324_v21, %v310_v7 }
  0xb5   : > { %v698_v14 = vsel %vm694_vm0, %v328_v12, %v659_v10  ;;  %v697_v20 = vsel %vm694_vm0, %v327_v11, %v658_v9  ;;  %vm1042_vm0 = vcmask 3072  }
  0xb6   : > { %v732_v15 = vpack.c.bf16 %v698_v14, %v696_v13  ;;  %v731_v16 = vpack.c.bf16 %v697_v20, %v695_v19 }
  0xb8   : > { %839 = vmatprep.subr.bf16.mxu0 %v732_v15  ;;  %1239 = vmatprep.subr.bf16.mxu1 %v732_v15 }
  0xb9   : > { %840 = vmatpush1.bf16.msra.mxu0 %v731_v16  ;;  %1245 = vmatpush1.bf16.msra.mxu1 %v731_v16 }
  0xbc   : > { %1209 = vmatmul.mubr.msk.bf16.vlgmr.msra.gmra.mxu0 %vm812_vm3, %v1274_v17  ;;  %1211 = vmatmul.mubr.msk.bf16.vlgmr.msra.gmra.mxu1 %vm812_vm3, %v1275_v18 }
  0xbd   : > { %867 = vmatprep.mubr.bf16.mxu0 %v1299_v6  ;;  %887 = vmatprep.mubr.bf16.mxu1 %v1299_v6 }
  0xbe   : > { %v760_v6 = vpop.permute.xlu1 %759  ;;  %v755_v27 = vpop.permute.xlu0 %754 }
  0xc2   : > { %v765_v30 = vpop.permute.xlu1 %764  ;;  %v1597_v31 = vpop.permute.xlu0 %769 }
  0xc4   : > { %1210 = vmatmul.mubr.msk.bf16.gmra.mxu0 %vm812_vm3, %v1276_v22  ;;  %1212 = vmatmul.mubr.msk.bf16.gmra.mxu1 %vm812_vm3, %v1277_v23 }
  0xc6   : > { %v775_v32 = vpop.permute.xlu1 %774  ;;  %v780_v48 = vpop.permute.xlu0 %779 }
  0xca   : > { %v785_v58 = vpop.permute.xlu1 %784  ;;  %v790_v7 = vpop.permute.xlu0 %789 }
 0x132   : > { %v1040_v17 = vpop.xlane.xlu1 %1039 }
 0x133   : > { %v1041_v22 = vmul.f32 0.00390625, %v1040_v17 }
 0x135   : > { %1043 = vst.msk [vmem:[%s274_s13] sm:$0xf] %vm1042_vm0, %v1041_v22 }
 0x17c   : > { %v859_v33 = vpop.f32.mrf.mxu0  ;;  %v879_v34 = vpop.f32.mrf.mxu1 }
 0x17d   : > { %v880_v35 = vadd.f32 %v879_v34, %v775_v32  ;;  %v860_v40 = vadd.f32 %v859_v33, %v755_v27 }
 0x17e   : > { %v861_v38 = vpop.f32.mrf.mxu0  ;;  %v881_v39 = vpop.f32.mrf.mxu1 }
 0x17f   : > { %v862_v0 = vadd.f32 %v861_v38, %v755_v27  ;;  %v882_v41 = vadd.f32 %v881_v39, %v775_v32  ;;  %v978_v57 = vmul.f32 %v860_v40, %v860_v40  ;;  %v986_v3 = vmul.f32 %v880_v35, %v880_v35 }
 0x180   : > { %v863_v1 = vpop.f32.mrf.mxu0  ;;  %v883_v45 = vpop.f32.mrf.mxu1 }
 0x181   : > { %v1226_v49 = vpack.c.bf16 %v862_v0, %v860_v40  ;;  %v1230_v36 = vpack.c.bf16 %v882_v41, %v880_v35  ;;  %v954_v51 = vadd.f32 %v862_v0, %v860_v40  ;;  %v966_v52 = vadd.f32 %v882_v41, %v880_v35 }
 0x182   : > { %v865_v37 = vpop.f32.mrf.mxu0  ;;  %v885_v50 = vpop.f32.mrf.mxu1  ;;  %v979_v53 = vmul.f32 %v862_v0, %v862_v0  ;;  %v864_v42 = vadd.f32 %v863_v1, %v760_v6  ;;  %v884_v43 = vadd.f32 %v883_v45, %v780_v48  ;;  %v987_v28 = vmul.f32 %v882_v41, %v882_v41 }
 0x183   : > { %946 = vst [vmem:[%s1605_s9] sm:$0xff] %v1226_v49  ;;  %950 = vst [vmem:[%s1605_s9 + $0x20] sm:$0xff] %v1230_v36  ;;  %v866_v44 = vadd.f32 %v865_v37, %v760_v6  ;;  %v886_v54 = vadd.f32 %v885_v50, %v780_v48  ;;  %955 = vadd.xlane.f32.xlu0 %v954_v51  ;;  %967 = vadd.xlane.f32.xlu1 %v966_v52 }
 0x184   : > { %v869_v55 = vpop.f32.mrf.mxu0  ;;  %v889_v56 = vpop.f32.mrf.mxu1  ;;  %v994_v63 = vadd.f32 %v979_v53, %v978_v57  ;;  %v1006_v13 = vadd.f32 %v987_v28, %v986_v3  ;;  %v980_v18 = vmul.f32 %v864_v42, %v864_v42  ;;  %v988_v27 = vmul.f32 %v884_v43, %v884_v43 }
 0x185   : > { %v1227_v59 = vpack.c.bf16 %v866_v44, %v864_v42  ;;  %v1231_v60 = vpack.c.bf16 %v886_v54, %v884_v43  ;;  %v957_v62 = vadd.f32 %v866_v44, %v864_v42  ;;  %v870_v46 = vadd.f32 %v869_v55, %v765_v30 }
 0x186   : > { %v871_v2 = vpop.f32.mrf.mxu0  ;;  %v891_v61 = vpop.f32.mrf.mxu1  ;;  %v890_v21 = vadd.f32 %v889_v56, %v785_v58  ;;  %v969_v12 = vadd.f32 %v886_v54, %v884_v43  ;;  %v981_v14 = vmul.f32 %v866_v44, %v866_v44  ;;  %v989_v6 = vmul.f32 %v886_v54, %v886_v54 }
 0x187   : > { %947 = vst [vmem:[%s1605_s9 + $0x8] sm:$0xff] %v1227_v59  ;;  %951 = vst [vmem:[%s1605_s9 + $0x28] sm:$0xff] %v1231_v60  ;;  %v872_v29 = vadd.f32 %v871_v2, %v765_v30  ;;  %v892_v47 = vadd.f32 %v891_v61, %v785_v58  ;;  %958 = vadd.xlane.f32.xlu0 %v957_v62  ;;  %995 = vadd.xlane.f32.xlu1 %v994_v63 }
 0x188   : > { %v873_v4 = vpop.f32.mrf.mxu0  ;;  %v893_v5 = vpop.f32.mrf.mxu1  ;;  %v997_v25 = vadd.f32 %v981_v14, %v980_v18  ;;  %v1009_v30 = vadd.f32 %v989_v6, %v988_v27  ;;  %v982_v33 = vmul.f32 %v870_v46, %v870_v46  ;;  %v990_v39 = vmul.f32 %v890_v21, %v890_v21 }
 0x189   : > { %v1228_v8 = vpack.c.bf16 %v872_v29, %v870_v46  ;;  %v1232_v9 = vpack.c.bf16 %v892_v47, %v890_v21  ;;  %v874_v19 = vadd.f32 %v873_v4, %v1597_v31  ;;  %v894_v20 = vadd.f32 %v893_v5, %v790_v7 }
 0x18a   : > { %v875_v10 = vpop.f32.mrf.mxu0  ;;  %v895_v11 = vpop.f32.mrf.mxu1  ;;  %v960_v26 = vadd.f32 %v872_v29, %v870_v46  ;;  %v983_v32 = vmul.f32 %v872_v29, %v872_v29  ;;  %v991_v38 = vmul.f32 %v892_v47, %v892_v47 }
 0x18b   : > { %948 = vst [vmem:[%s1605_s9 + $0x10] sm:$0xff] %v1228_v8  ;;  %952 = vst [vmem:[%s1605_s9 + $0x30] sm:$0xff] %v1232_v9  ;;  %v876_v15 = vadd.f32 %v875_v10, %v1597_v31  ;;  %v896_v16 = vadd.f32 %v895_v11, %v790_v7  ;;  %970 = vadd.xlane.f32.xlu0 %v969_v12  ;;  %1007 = vadd.xlane.f32.xlu1 %v1006_v13 }
 0x18c   : > { %v972_v31 = vadd.f32 %v892_v47, %v890_v21  ;;  %v1000_v35 = vadd.f32 %v983_v32, %v982_v33  ;;  %v1012_v0 = vadd.f32 %v991_v38, %v990_v39  ;;  %v984_v1 = vmul.f32 %v874_v19, %v874_v19 }
 0x18d   : > { %v1229_v23 = vpack.c.bf16 %v876_v15, %v874_v19  ;;  %v1233_v24 = vpack.c.bf16 %v896_v16, %v894_v20  ;;  %v963_v34 = vadd.f32 %v876_v15, %v874_v19  ;;  %v975_v40 = vadd.f32 %v896_v16, %v894_v20 }
 0x18e   : > { %v985_v41 = vmul.f32 %v876_v15, %v876_v15  ;;  %v993_v48 = vmul.f32 %v896_v16, %v896_v16  ;;  %v992_v49 = vmul.f32 %v894_v20, %v894_v20 }
 0x18f   : > { %949 = vst [vmem:[%s1605_s9 + $0x18] sm:$0xff] %v1229_v23  ;;  %953 = vst [vmem:[%s1605_s9 + $0x38] sm:$0xff] %v1233_v24  ;;  %998 = vadd.xlane.f32.xlu0 %v997_v25  ;;  %961 = vadd.xlane.f32.xlu1 %v960_v26 }
 0x190   : > { %v1003_v45 = vadd.f32 %v985_v41, %v984_v1  ;;  %v1015_v36 = vadd.f32 %v993_v48, %v992_v49 }
 0x193   : > { %1010 = vadd.xlane.f32.xlu0 %v1009_v30  ;;  %973 = vadd.xlane.f32.xlu1 %v972_v31 }
 0x197   : > { %964 = vadd.xlane.f32.xlu0 %v963_v34  ;;  %1001 = vadd.xlane.f32.xlu1 %v1000_v35 }
 0x19b   : > { %976 = vadd.xlane.f32.xlu0 %v975_v40  ;;  %1013 = vadd.xlane.f32.xlu1 %v1012_v0 }
 0x19f   : > { %1004 = vadd.xlane.f32.xlu0 %v1003_v45 }
 0x1a3   : > { %1016 = vadd.xlane.f32.xlu0 %v1015_v36 }
 0x20c   : > { %v956_v37 = vpop.xlane.xlu0 %955  ;;  %v968_v50 = vpop.xlane.xlu1 %967 }
 0x210   : > { %v959_v51 = vpop.xlane.xlu0 %958  ;;  %v996_v52 = vpop.xlane.xlu1 %995 }
 0x211   : > { %v1019_v53 = vsel %vm1018_vm4, %v956_v37, %v996_v52 }
 0x212   : > { %1028 = vst.msk [vmem:[%s1627_s16] sm:$0xff] %vm1027_vm5, %v1019_v53 }
 0x214   : > { %v971_v42 = vpop.xlane.xlu0 %970  ;;  %v1008_v43 = vpop.xlane.xlu1 %1007 }
 0x215   : > { %v1023_v44 = vsel %vm1018_vm4, %v968_v50, %v1008_v43 }
 0x216   : > { %1032 = vst.msk [vmem:[%s1627_s16 + $0x20] sm:$0xff] %vm1027_vm5, %v1023_v44 }
 0x218   : > { %v999_v54 = vpop.xlane.xlu0 %998  ;;  %v962_v55 = vpop.xlane.xlu1 %961 }
 0x219   : > { %v1020_v56 = vsel %vm1018_vm4, %v959_v51, %v999_v54 }
 0x21a   : > { %1029 = vst.msk [vmem:[%s1627_s16 + $0x8] sm:$0xff] %vm1027_vm5, %v1020_v56 }
 0x21c   : > { %v1011_v57 = vpop.xlane.xlu0 %1010  ;;  %v974_v58 = vpop.xlane.xlu1 %973 }
 0x21d   : > { %v1024_v59 = vsel %vm1018_vm4, %v971_v42, %v1011_v57 }
 0x21e   : > { %1033 = vst.msk [vmem:[%s1627_s16 + $0x28] sm:$0xff] %vm1027_vm5, %v1024_v59 }
 0x220   : > { %v965_v60 = vpop.xlane.xlu0 %964  ;;  %v1002_v2 = vpop.xlane.xlu1 %1001 }
 0x221   : > { %v1021_v61 = vsel %vm1018_vm4, %v962_v55, %v1002_v2 }
 0x222   : > { %1030 = vst.msk [vmem:[%s1627_s16 + $0x10] sm:$0xff] %vm1027_vm5, %v1021_v61 }
 0x224   : > { %v977_v62 = vpop.xlane.xlu0 %976  ;;  %v1014_v63 = vpop.xlane.xlu1 %1013 }
 0x225   : > { %v1025_v3 = vsel %vm1018_vm4, %v974_v58, %v1014_v63 }
 0x226   : > { %1034 = vst.msk [vmem:[%s1627_s16 + $0x30] sm:$0xff] %vm1027_vm5, %v1025_v3 }
 0x228   : > { %v1005_v28 = vpop.xlane.xlu0 %1004 }
 0x229   : > { %v1022_v46 = vsel %vm1018_vm4, %v965_v60, %v1005_v28 }
 0x22a   : > { %1031 = vst.msk [vmem:[%s1627_s16 + $0x18] sm:$0xff] %vm1027_vm5, %v1022_v46 }
 0x22c   : > { %v1017_v21 = vpop.xlane.xlu0 %1016 }
 0x22d   : > { %v1026_v29 = vsel %vm1018_vm4, %v977_v62, %v1017_v21 }
 0x22e   : > { %1035 = vst.msk [vmem:[%s1627_s16 + $0x38] sm:$0xff] %vm1027_vm5, %v1026_v29 }
 0x22f PF: > { %s17_s21 = sadd.s32 1, %s1284_s21  }
 0x230   : > { %p14_p4 = scmp.ge.s32.totalorder %s17_s21, 4  }
 0x232   :  { %16 = sbr.rel (!%p14_p4) target bundleno = 1 (0x1), region = 106 }

// kernel: _lambda_.7
= control target key start
LH: loop header
LB: loop body
LE: loop exit
PB: predicated region body
PF: predicated region fallthrough
CT: control target
= control target key end

     0   :  { %s442_s12 = smov 0   ;;  %s444_s13 = smov 0   ;;  %s487_s0 = inlined_call_operand.vmem [shape: bf16[2,16,256], index: 0, kind: input, shape index: {}, may-alias: {0,3}]   ;;  %s488_s1 = inlined_call_operand.vmem [shape: f32[16,1], index: 1, kind: input, shape index: {}]   ;;  %s489_s2 = inlined_call_operand.vmem [shape: f32[16,1], index: 2, kind: input, shape index: {}]   ;;  %s490_s3 = inlined_call_operand.vmem [shape: bf16[2,16,256], index: 3, kind: output, shape index: {}, may-alias: {0,3}]  }
   0x1   :  { %s446_s14 = smov 0  }
   0x2 LB: > { %s25_s15 = sadd.s32 1, %s415_s13  ;;  %p357_p0 = scmp.ge.s32.totalorder %s419_s14, 1  ;;  %s419_s14 = sphi %s446_s14, %s13_s14   ;;  %s415_s13 = sphi %s444_s13, %s492_s13   ;;  %s411_s12 = sphi %s442_s12, %s491_s12  }
   0x3   : > { %p27_p1 = scmp.ge.s32.totalorder %s25_s15, 2  ;;  %p158_p2 = scmp.lt.s32.totalorder %s419_s14, 3 }
   0x5   : > { %s494_s15 = smov (%p27_p1, %s25_s15), 0  ;;  %p159_p3 = pnand %p357_p0, %p158_p2 }
   0x6   : > { %p191_p4 = scmp.lt.s32.totalorder (!%p159_p3), %s411_s12, 1 }
   0x7   : > { %162 = sbr.rel (%p159_p3) target bundleno = 151 (0x97), region = 32 }
   0xc   : > { %v232_v0 = vld [vmem:[%s489_s2] sm:$0xff]  ;;  %v421_v2 = vmov 0   ;;  %v233_v3 = vld [vmem:[%s489_s2 + $0x8] sm:$0xff]  ;;  %s496_s12 = smov (!%p191_p4, %s411_s12), 1 }
   0xd   : > { %v216_v1 = vld [vmem:[%s488_s1] sm:$0xff]  ;;  %396 = vset.pattern.permute.xlu1 %v421_v2  ;;  %395 = vset.pattern.permute.xlu0 %v421_v2  ;;  %v217_v4 = vld [vmem:[%s488_s1 + $0x8] sm:$0xff]  ;;  %s366_s24 = sshll.u32 %s496_s12, 4 }
   0xe   : > { %236 = vperm.xlu1 %396, %v232_v0   ;;  %220 = vperm.xlu0 %395, %v216_v1   ;;  %s198_s27 = scalar_lea.vmem %s487_s0, %s366_s24  ;;  %s208_s30 = scalar_lea.vmem %s490_s3, %s366_s24 }
   0xf   : > { %v210_v5 = vld [vmem:[%s198_s27] sm:$0xff]  ;;  %v211_v8 = vld [vmem:[%s198_s27 + $0x8] sm:$0xff] }
  0x10   : > { %v212_v6 = vunpack.c.l.bf16 %v210_v5  ;;  %v213_v7 = vunpack.c.h.bf16 %v210_v5  ;;  %v214_v13 = vunpack.c.l.bf16 %v211_v8  ;;  %v215_v14 = vunpack.c.h.bf16 %v211_v8 }
  0x12   : > { %241 = vperm.xlu1 %396, %v233_v3   ;;  %225 = vperm.xlu0 %395, %v217_v4  }
  0x89   : > { %v237_v9 = vpop.permute.xlu1 %236  ;;  %v221_v10 = vpop.permute.xlu0 %220 }
  0x8a   : > { %v228_v11 = vmul.f32 %v221_v10, %v212_v6  ;;  %v229_v12 = vmul.f32 %v221_v10, %v213_v7 }
  0x8c   : > { %v244_v15 = vadd.f32 %v237_v9, %v228_v11  ;;  %v245_v16 = vadd.f32 %v237_v9, %v229_v12 }
  0x8d   : > { %v226_v17 = vpop.permute.xlu0 %225  ;;  %v242_v22 = vpop.permute.xlu1 %241 }
  0x8e   : > { %v248_v18 = vmax.f32 %v244_v15, 0.0  ;;  %v249_v19 = vmax.f32 %v245_v16, 0.0  ;;  %v230_v20 = vmul.f32 %v226_v17, %v214_v13  ;;  %v231_v21 = vmul.f32 %v226_v17, %v215_v14 }
  0x90   : > { %v368_v23 = vpack.c.bf16 %v249_v19, %v248_v18  ;;  %v246_v24 = vadd.f32 %v242_v22, %v230_v20  ;;  %v247_v25 = vadd.f32 %v242_v22, %v231_v21 }
  0x92   : > { %v250_v26 = vmax.f32 %v246_v24, 0.0  ;;  %v251_v27 = vmax.f32 %v247_v25, 0.0  ;;  %264 = vst [vmem:[%s208_s30] sm:$0xff] %v368_v23 }
  0x94   : > { %v369_v28 = vpack.c.bf16 %v251_v27, %v250_v26 }
  0x96   : > { %265 = vst [vmem:[%s208_s30 + $0x8] sm:$0xff] %v369_v28 }
  0x97 PF: > { %s13_s14 = sadd.s32 1, %s419_s14   ;;  %s491_s12 = smov %s415_s13 }
  0x98   : > { %p10_p5 = scmp.ge.s32.totalorder %s13_s14, 4   ;;  %s492_s13 = smov %s494_s15 }
  0x9a   :  { %12 = sbr.rel (!%p10_p5) target bundleno = 2 (0x2), region = 62 }

</bundles_post_ra>
